<compile_context>
chip_gen: v5e
topology: v5e:2x2
jax: 0.10.0
libtpu: 0.0.40
codegen_flags: <defaults>
</compile_context>

<pallas_src>
import jax
import jax.numpy as jnp
from jax.experimental import pallas as pl
from jax.experimental.pallas import tpu as pltpu

H = W = 28          # fixed by Linear(2 * 28 * 28, dim) in the module
HW = H * W          # 784
HWP = 896           # 784 padded up to a multiple of 128 lanes
DIM = 32            # classifier output dim
B = 2               # batch


def cell_kernel(x_ref, mask_ref, wconv_ref, w1_ref, w2_ref, b_ref, out_ref):
    """Fused Cell forward, all in flattened lane-dense layout.

    x_ref    : (B, 896)   f32 VMEM  flattened image, lanes 784..895 are zero
    mask_ref : (4, 896)   f32 VMEM  rows: [row>0, row<27, col>0, col<27] (and k<784)
    wconv_ref: (3, 3)     f32 SMEM  conv kernel (op_1_2)
    w1_ref   : (896, DIM) f32 VMEM  classifier rows for the identity half (zero-padded)
    w2_ref   : (896, DIM) f32 VMEM  classifier rows for the conv half (zero-padded)
    b_ref    : (1, DIM)   f32 VMEM  classifier bias
    out_ref  : (B, DIM)   f32 VMEM
    """
    x = x_ref[...]                      # (B, 896)
    masks = mask_ref[...]               # (4, 896)
    m_rt = masks[0:1, :]                # may access row above    (di = -1)
    m_rb = masks[1:2, :]                # may access row below    (di = +1)
    m_cl = masks[2:3, :]                # may access column left  (dj = -1)
    m_cr = masks[3:4, :]                # may access column right (dj = +1)

    def shift(v, d):
        # result[k] = v[(k + d) mod 896]; every wrapped / out-of-image position
        # is multiplied by a zero mask, and the lane-padding region of x is 0,
        # so the modular wrap never leaks into valid outputs.
        return pltpu.roll(v, shift=(-d) % HWP, axis=1)

    # --- op_0_1: AvgPool2d(3, stride=1, padding=1), count_include_pad=True.
    # Separable 3x3 box filter: rows (±28 lane rolls) then columns (±1 rolls).
    rs = x + m_rt * shift(x, -W) + m_rb * shift(x, W)
    s01 = (rs + m_cl * shift(rs, -1) + m_cr * shift(rs, 1)) * (1.0 / 9.0)

    # --- op_1_2: Conv2d(1, 1, 3, stride=1, padding=1, bias=False).
    # 9 masked lane rolls; w[a, b] pairs with spatial offset (a-1, b-1)
    # (cross-correlation, matching nn.Conv2d).
    m_tl = m_rt * m_cl
    m_tr = m_rt * m_cr
    m_bl = m_rb * m_cl
    m_br = m_rb * m_cr
    s12 = wconv_ref[1, 1] * s01
    s12 = s12 + wconv_ref[1, 0] * (m_cl * shift(s01, -1))
    s12 = s12 + wconv_ref[1, 2] * (m_cr * shift(s01, 1))
    s12 = s12 + wconv_ref[0, 1] * (m_rt * shift(s01, -W))
    s12 = s12 + wconv_ref[2, 1] * (m_rb * shift(s01, W))
    s12 = s12 + wconv_ref[0, 0] * (m_tl * shift(s01, -W - 1))
    s12 = s12 + wconv_ref[0, 2] * (m_tr * shift(s01, -W + 1))
    s12 = s12 + wconv_ref[2, 0] * (m_bl * shift(s01, W - 1))
    s12 = s12 + wconv_ref[2, 2] * (m_br * shift(s01, W + 1))

    # --- classifier: out = concat([s02, s12]) @ W + b, as two lane-dense
    # K=896 MXU contractions (padded weight rows are zero, so the 112 lane-pad
    # columns of x / s12 contribute nothing).
    acc = jnp.dot(x, w1_ref[...], preferred_element_type=jnp.float32)
    acc = acc + jnp.dot(s12, w2_ref[...], preferred_element_type=jnp.float32)
    out_ref[...] = acc + b_ref[...]


def cell_forward(x, w_conv, w_cls, b_cls):
    """x: (B, 1, 28, 28) f32 NCHW  ->  (B, DIM) f32."""
    nb = x.shape[0]
    x_flat = jnp.pad(x.reshape(nb, HW), ((0, 0), (0, HWP - HW)))   # (B, 896)
    w1 = jnp.pad(w_cls[:HW], ((0, HWP - HW), (0, 0)))              # (896, DIM)
    w2 = jnp.pad(w_cls[HW:], ((0, HWP - HW), (0, 0)))              # (896, DIM)

    # Static edge-validity masks in the flattened layout (constants under jit).
    k = jnp.arange(HWP, dtype=jnp.int32)
    row = k // W
    col = k % W
    valid = k < HW
    masks = jnp.stack([
        (row != 0) & valid,         # may read row above   (di = -1)
        (row != H - 1) & valid,     # may read row below   (di = +1)
        (col != 0) & valid,         # may read column left (dj = -1)
        (col != W - 1) & valid,     # may read column right(dj = +1)
    ]).astype(jnp.float32)          # (4, 896)

    vmem = pltpu.MemorySpace.VMEM
    smem = pltpu.MemorySpace.SMEM
    return pl.pallas_call(
        cell_kernel,
        out_shape=jax.ShapeDtypeStruct((nb, DIM), jnp.float32),
        in_specs=[
            pl.BlockSpec(memory_space=vmem),    # x flat (padded to 896 lanes)
            pl.BlockSpec(memory_space=vmem),    # edge masks
            pl.BlockSpec(memory_space=smem),    # conv 3x3 weights (scalars)
            pl.BlockSpec(memory_space=vmem),    # W1 (identity half)
            pl.BlockSpec(memory_space=vmem),    # W2 (conv half)
            pl.BlockSpec(memory_space=vmem),    # bias
        ],
        out_specs=pl.BlockSpec(memory_space=vmem),
    )(x_flat, masks, w_conv, w1, w2, b_cls)


def ref_forward(x, w_conv, w_cls, b_cls):
    """Plain-JAX reference for correctness checking."""
    nb = x.shape[0]
    xs = x[:, 0, :, :]
    xpad = jnp.pad(xs, ((0, 0), (1, 1), (1, 1)))
    s01 = sum(
        xpad[:, di:di + H, dj:dj + W] for di in range(3) for dj in range(3)
    ) / 9.0
    s01p = jnp.pad(s01, ((0, 0), (1, 1), (1, 1)))
    s12 = sum(
        w_conv[di, dj] * s01p[:, di:di + H, dj:dj + W]
        for di in range(3) for dj in range(3)
    )
    feat = jnp.concatenate(
        [xs.reshape(nb, HW), s12.reshape(nb, HW)], axis=1
    )
    return feat @ w_cls + b_cls


if __name__ == "__main__":
    key = jax.random.PRNGKey(0)
    kx, kw, kc, kb = jax.random.split(key, 4)

    x = jax.random.normal(kx, (B, 1, H, W), dtype=jnp.float32)
    w_conv = jax.random.normal(kw, (3, 3), dtype=jnp.float32) * 0.3
    fan_in = 2 * H * W
    w_cls = jax.random.normal(kc, (fan_in, DIM), dtype=jnp.float32) * (
        1.0 / jnp.sqrt(fan_in)
    )
    b_cls = jax.random.normal(kb, (1, DIM), dtype=jnp.float32) * 0.01

    out = jax.jit(cell_forward)(x, w_conv, w_cls, b_cls)
    out = jax.block_until_ready(out)

    ref = ref_forward(x, w_conv, w_cls, b_cls)
    assert out.shape == (B, DIM)
    assert jnp.allclose(out, ref, atol=1e-3, rtol=1e-3), "mismatch vs reference"
    print("KERNEL_OK")
</pallas_src>

<mosaic_0001>
module attributes {stable_mosaic.version = 11 : i64} {
  func.func @cell_kernel(%arg0: memref<2x896xf32, #tpu.memory_space<vmem>>, %arg1: memref<4x896xf32, #tpu.memory_space<vmem>>, %arg2: memref<3x3xf32, #tpu.memory_space<smem>>, %arg3: memref<896x32xf32, #tpu.memory_space<vmem>>, %arg4: memref<896x32xf32, #tpu.memory_space<vmem>>, %arg5: memref<1x32xf32, #tpu.memory_space<vmem>>, %arg6: memref<2x32xf32, #tpu.memory_space<vmem>>) attributes {dimension_semantics = [], scalar_prefetch = 0 : i64, scratch_operands = 0 : i64, tpu.core_type = #tpu.core_type<tc>} {
    %c0 = arith.constant 0 : index
    %c0_0 = arith.constant 0 : index
    %0 = vector.load %arg0[%c0, %c0_0] : memref<2x896xf32, #tpu.memory_space<vmem>>, vector<2x896xf32>
    %c0_1 = arith.constant 0 : index
    %c0_2 = arith.constant 0 : index
    %1 = vector.load %arg1[%c0_1, %c0_2] : memref<4x896xf32, #tpu.memory_space<vmem>>, vector<4x896xf32>
    %2 = vector.extract_strided_slice %1 {offsets = [0, 0], sizes = [1, 896], strides = [1, 1]} : vector<4x896xf32> to vector<1x896xf32>
    %3 = vector.extract_strided_slice %1 {offsets = [1, 0], sizes = [1, 896], strides = [1, 1]} : vector<4x896xf32> to vector<1x896xf32>
    %4 = vector.extract_strided_slice %1 {offsets = [2, 0], sizes = [1, 896], strides = [1, 1]} : vector<4x896xf32> to vector<1x896xf32>
    %5 = vector.extract_strided_slice %1 {offsets = [3, 0], sizes = [1, 896], strides = [1, 1]} : vector<4x896xf32> to vector<1x896xf32>
    %c28_i32 = arith.constant 28 : i32
    %6 = tpu.dynamic_rotate %0 by %c28_i32 dim 1 : vector<2x896xf32>, i32 -> vector<2x896xf32>
    %7 = vector.broadcast %2 : vector<1x896xf32> to vector<2x896xf32>
    %8 = arith.mulf %7, %6 : vector<2x896xf32>
    %9 = arith.addf %0, %8 : vector<2x896xf32>
    %c868_i32 = arith.constant 868 : i32
    %10 = tpu.dynamic_rotate %0 by %c868_i32 dim 1 : vector<2x896xf32>, i32 -> vector<2x896xf32>
    %11 = vector.broadcast %3 : vector<1x896xf32> to vector<2x896xf32>
    %12 = arith.mulf %11, %10 : vector<2x896xf32>
    %13 = arith.addf %9, %12 : vector<2x896xf32>
    %c1_i32 = arith.constant 1 : i32
    %14 = tpu.dynamic_rotate %13 by %c1_i32 dim 1 : vector<2x896xf32>, i32 -> vector<2x896xf32>
    %15 = vector.broadcast %4 : vector<1x896xf32> to vector<2x896xf32>
    %16 = arith.mulf %15, %14 : vector<2x896xf32>
    %17 = arith.addf %13, %16 : vector<2x896xf32>
    %c895_i32 = arith.constant 895 : i32
    %18 = tpu.dynamic_rotate %13 by %c895_i32 dim 1 : vector<2x896xf32>, i32 -> vector<2x896xf32>
    %19 = vector.broadcast %5 : vector<1x896xf32> to vector<2x896xf32>
    %20 = arith.mulf %19, %18 : vector<2x896xf32>
    %21 = arith.addf %17, %20 : vector<2x896xf32>
    %cst = arith.constant 0.111111112 : f32
    %22 = vector.broadcast %cst : f32 to vector<2x896xf32>
    %23 = arith.mulf %21, %22 : vector<2x896xf32>
    %24 = arith.mulf %2, %4 : vector<1x896xf32>
    %25 = arith.mulf %2, %5 : vector<1x896xf32>
    %26 = arith.mulf %3, %4 : vector<1x896xf32>
    %27 = arith.mulf %3, %5 : vector<1x896xf32>
    %c1 = arith.constant 1 : index
    %c1_3 = arith.constant 1 : index
    %28 = memref.load %arg2[%c1, %c1_3] : memref<3x3xf32, #tpu.memory_space<smem>>
    %29 = vector.broadcast %28 : f32 to vector<2x896xf32>
    %30 = arith.mulf %29, %23 : vector<2x896xf32>
    %c1_4 = arith.constant 1 : index
    %c0_5 = arith.constant 0 : index
    %31 = memref.load %arg2[%c1_4, %c0_5] : memref<3x3xf32, #tpu.memory_space<smem>>
    %c1_i32_6 = arith.constant 1 : i32
    %32 = tpu.dynamic_rotate %23 by %c1_i32_6 dim 1 : vector<2x896xf32>, i32 -> vector<2x896xf32>
    %33 = vector.broadcast %4 : vector<1x896xf32> to vector<2x896xf32>
    %34 = arith.mulf %33, %32 : vector<2x896xf32>
    %35 = vector.broadcast %31 : f32 to vector<2x896xf32>
    %36 = arith.mulf %35, %34 : vector<2x896xf32>
    %37 = arith.addf %30, %36 : vector<2x896xf32>
    %c1_7 = arith.constant 1 : index
    %c2 = arith.constant 2 : index
    %38 = memref.load %arg2[%c1_7, %c2] : memref<3x3xf32, #tpu.memory_space<smem>>
    %c895_i32_8 = arith.constant 895 : i32
    %39 = tpu.dynamic_rotate %23 by %c895_i32_8 dim 1 : vector<2x896xf32>, i32 -> vector<2x896xf32>
    %40 = vector.broadcast %5 : vector<1x896xf32> to vector<2x896xf32>
    %41 = arith.mulf %40, %39 : vector<2x896xf32>
    %42 = vector.broadcast %38 : f32 to vector<2x896xf32>
    %43 = arith.mulf %42, %41 : vector<2x896xf32>
    %44 = arith.addf %37, %43 : vector<2x896xf32>
    %c0_9 = arith.constant 0 : index
    %c1_10 = arith.constant 1 : index
    %45 = memref.load %arg2[%c0_9, %c1_10] : memref<3x3xf32, #tpu.memory_space<smem>>
    %c28_i32_11 = arith.constant 28 : i32
    %46 = tpu.dynamic_rotate %23 by %c28_i32_11 dim 1 : vector<2x896xf32>, i32 -> vector<2x896xf32>
    %47 = vector.broadcast %2 : vector<1x896xf32> to vector<2x896xf32>
    %48 = arith.mulf %47, %46 : vector<2x896xf32>
    %49 = vector.broadcast %45 : f32 to vector<2x896xf32>
    %50 = arith.mulf %49, %48 : vector<2x896xf32>
    %51 = arith.addf %44, %50 : vector<2x896xf32>
    %c2_12 = arith.constant 2 : index
    %c1_13 = arith.constant 1 : index
    %52 = memref.load %arg2[%c2_12, %c1_13] : memref<3x3xf32, #tpu.memory_space<smem>>
    %c868_i32_14 = arith.constant 868 : i32
    %53 = tpu.dynamic_rotate %23 by %c868_i32_14 dim 1 : vector<2x896xf32>, i32 -> vector<2x896xf32>
    %54 = vector.broadcast %3 : vector<1x896xf32> to vector<2x896xf32>
    %55 = arith.mulf %54, %53 : vector<2x896xf32>
    %56 = vector.broadcast %52 : f32 to vector<2x896xf32>
    %57 = arith.mulf %56, %55 : vector<2x896xf32>
    %58 = arith.addf %51, %57 : vector<2x896xf32>
    %c0_15 = arith.constant 0 : index
    %c0_16 = arith.constant 0 : index
    %59 = memref.load %arg2[%c0_15, %c0_16] : memref<3x3xf32, #tpu.memory_space<smem>>
    %c29_i32 = arith.constant 29 : i32
    %60 = tpu.dynamic_rotate %23 by %c29_i32 dim 1 : vector<2x896xf32>, i32 -> vector<2x896xf32>
    %61 = vector.broadcast %24 : vector<1x896xf32> to vector<2x896xf32>
    %62 = arith.mulf %61, %60 : vector<2x896xf32>
    %63 = vector.broadcast %59 : f32 to vector<2x896xf32>
    %64 = arith.mulf %63, %62 : vector<2x896xf32>
    %65 = arith.addf %58, %64 : vector<2x896xf32>
    %c0_17 = arith.constant 0 : index
    %c2_18 = arith.constant 2 : index
    %66 = memref.load %arg2[%c0_17, %c2_18] : memref<3x3xf32, #tpu.memory_space<smem>>
    %c27_i32 = arith.constant 27 : i32
    %67 = tpu.dynamic_rotate %23 by %c27_i32 dim 1 : vector<2x896xf32>, i32 -> vector<2x896xf32>
    %68 = vector.broadcast %25 : vector<1x896xf32> to vector<2x896xf32>
    %69 = arith.mulf %68, %67 : vector<2x896xf32>
    %70 = vector.broadcast %66 : f32 to vector<2x896xf32>
    %71 = arith.mulf %70, %69 : vector<2x896xf32>
    %72 = arith.addf %65, %71 : vector<2x896xf32>
    %c2_19 = arith.constant 2 : index
    %c0_20 = arith.constant 0 : index
    %73 = memref.load %arg2[%c2_19, %c0_20] : memref<3x3xf32, #tpu.memory_space<smem>>
    %c869_i32 = arith.constant 869 : i32
    %74 = tpu.dynamic_rotate %23 by %c869_i32 dim 1 : vector<2x896xf32>, i32 -> vector<2x896xf32>
    %75 = vector.broadcast %26 : vector<1x896xf32> to vector<2x896xf32>
    %76 = arith.mulf %75, %74 : vector<2x896xf32>
    %77 = vector.broadcast %73 : f32 to vector<2x896xf32>
    %78 = arith.mulf %77, %76 : vector<2x896xf32>
    %79 = arith.addf %72, %78 : vector<2x896xf32>
    %c2_21 = arith.constant 2 : index
    %c2_22 = arith.constant 2 : index
    %80 = memref.load %arg2[%c2_21, %c2_22] : memref<3x3xf32, #tpu.memory_space<smem>>
    %c867_i32 = arith.constant 867 : i32
    %81 = tpu.dynamic_rotate %23 by %c867_i32 dim 1 : vector<2x896xf32>, i32 -> vector<2x896xf32>
    %82 = vector.broadcast %27 : vector<1x896xf32> to vector<2x896xf32>
    %83 = arith.mulf %82, %81 : vector<2x896xf32>
    %84 = vector.broadcast %80 : f32 to vector<2x896xf32>
    %85 = arith.mulf %84, %83 : vector<2x896xf32>
    %86 = arith.addf %79, %85 : vector<2x896xf32>
    %c0_23 = arith.constant 0 : index
    %c0_24 = arith.constant 0 : index
    %87 = vector.load %arg3[%c0_23, %c0_24] : memref<896x32xf32, #tpu.memory_space<vmem>>, vector<896x32xf32>
    %cst_25 = arith.constant dense<0.000000e+00> : vector<2x32xf32>
    %88 = tpu.matmul %0, %87, %cst_25 {dimension_numbers = #tpu.dot_dimension_numbers<[1], [0], [0], [1], [0, 0, 1, 1], [], []>} : vector<2x896xf32>, vector<896x32xf32>, vector<2x32xf32> -> vector<2x32xf32>
    %c0_26 = arith.constant 0 : index
    %c0_27 = arith.constant 0 : index
    %89 = vector.load %arg4[%c0_26, %c0_27] : memref<896x32xf32, #tpu.memory_space<vmem>>, vector<896x32xf32>
    %cst_28 = arith.constant dense<0.000000e+00> : vector<2x32xf32>
    %90 = tpu.matmul %86, %89, %cst_28 {dimension_numbers = #tpu.dot_dimension_numbers<[1], [0], [0], [1], [0, 0, 1, 1], [], []>} : vector<2x896xf32>, vector<896x32xf32>, vector<2x32xf32> -> vector<2x32xf32>
    %91 = arith.addf %88, %90 : vector<2x32xf32>
    %c0_29 = arith.constant 0 : index
    %c0_30 = arith.constant 0 : index
    %92 = vector.load %arg5[%c0_29, %c0_30] : memref<1x32xf32, #tpu.memory_space<vmem>>, vector<1x32xf32>
    %93 = vector.broadcast %92 : vector<1x32xf32> to vector<2x32xf32>
    %94 = arith.addf %91, %93 : vector<2x32xf32>
    %c0_31 = arith.constant 0 : index
    %c0_32 = arith.constant 0 : index
    %95 = vector.load %arg6[%c0_31, %c0_32] : memref<2x32xf32, #tpu.memory_space<vmem>>, vector<2x32xf32>
    tpu.vector_store %arg6[%c0_31, %c0_32], %94 {strides = array<i32>} : memref<2x32xf32, #tpu.memory_space<vmem>>, vector<2x32xf32>,
    return
  }
}

</mosaic_0001>

<bundles_post_ra>
// kernel: cell_forward.1
= control target key start
LH: loop header
LB: loop body
LE: loop exit
PB: predicated region body
PF: predicated region fallthrough
CT: control target
= control target key end

     0   :  { %11 = vsyncpa [#allocation4], 0  ;;  %s3353_s0 = inlined_call_operand.vmem [shape: f32[2,896], index: 0, kind: input, shape index: {}]   ;;  %s3354_s1 = inlined_call_operand.vmem [shape: f32[4,896], index: 1, kind: input, shape index: {}]   ;;  %s3355_s2 = inlined_call_operand.vmem [shape: f32[3,3], index: 2, kind: input, shape index: {}]   ;;  %s3356_s3 = inlined_call_operand.vmem [shape: f32[896,32], index: 3, kind: input, shape index: {}]   ;;  %s3357_s4 = inlined_call_operand.vmem [shape: f32[896,32], index: 4, kind: input, shape index: {}]   ;;  %s3358_s5 = inlined_call_operand.vmem [shape: f32[1,32], index: 5, kind: input, shape index: {}]   ;;  %s3359_s6 = inlined_call_operand.hbm [shape: f32[2,32], index: 6, kind: output, shape index: {}]  }
   0x1   :  { %12 = vsyncpa [#allocation3], 0  ;;  %s22_s23 = sshll.u32 %s3355_s2, 4  ;;  %s1803_s24 = smov [#allocation2]   ;;  %s23_s23 = int_to_ptr.vmem [resolvable:$true] %s22_s23 }
   0x2   :  { %25 = dma.vmem_to_smem %s23_s23, 64, %s1803_s24, [#allocation4]  }
   0x3   :  { %1799 = dma.done.wait [#allocation4], 64  }
   0x4   :  { %1800 = vsyncadd [#allocation4], 4294967232 }
   0x5   :  { %36 = sfence }
   0x6   :  { %v1854_v0 = vld [vmem:[%s3353_s0] sm:$0xff]  ;;  %v1859_v1 = vld [vmem:[%s3353_s0 + $0x8] sm:$0x3f]  ;;  %s1804_s2 = smov 28   ;;  %s1805_s0 = smov 100   ;;  %v76_v19 = vlaneseq  ;;  %v1882_v22 = vld [vmem:[%s3354_s1 + $0x10] sm:$0xff] }
   0x7   :  { %45 = vst [vmem:[#allocation1] ss:$4 sm:$0xff] %v1854_v0  ;;  %v1887_v24 = vld [vmem:[%s3354_s1 + $0x8] sm:$0xff]  ;;  %v1892_v25 = vld [vmem:[%s3354_s1] sm:$0xff]  ;;  %v95_v27 = vperm.slane %v1882_v22, 4  ;;  %v94_v34 = vperm.slane %v1882_v22, 0 }
   0x8   :  { %47 = vst [vmem:[#allocation1 + $0x20] ss:$4 sm:$0xff] %v1859_v1  ;;  %v1894_v26 = vand.u32 127, %v76_v19  ;;  %v93_v28 = vperm.slane %v1887_v24, 4  ;;  %v91_v29 = vperm.slane %v1892_v25, 4  ;;  %v92_v30 = vperm.slane %v1887_v24, 0 }
   0x9   :  { %v1903_v31 = vld [vmem:[%s3354_s1 + $0x18] sm:$0xf]  ;;  %v90_v35 = vperm.slane %v1892_v25, 0  ;;  %v1910_v36 = vperm.slane %v95_v27, 0  ;;  %v182_v44 = vperm.slane %v1892_v25, 5  ;;  %v183_v47 = vperm.slane %v1887_v24, 1 }
   0xa   :  { %vm78_vm0 = vcmp.lt.s32.totalorder %v1894_v26, 28  ;;  %v1912_v37 = vperm.slane %v93_v28, 0  ;;  %v1914_v38 = vperm.slane %v91_v29, 0  ;;  %v96_v39 = vperm.slane %v1903_v31, 0  ;;  %s1806_s13 = smov 1   ;;  %s1807_s14 = smov 127  }
   0xb   :  { %v1921_v42 = vperm.slane %v92_v30, 0  ;;  %v184_v48 = vperm.slane %v1887_v24, 5  ;;  %v1930_v49 = vperm.slane %v94_v34, 0  ;;  %v1932_v50 = vperm.slane %v90_v35, 0  ;;  %s1808_s15 = smov 29   ;;  %s1809_s16 = smov 27  }
   0xc   :  { %v1935_v52 = vperm.slane %v96_v39, 0  ;;  %vm173_vm1 = vcmp.lt.s32.totalorder %v1894_v26, 100  ;;  %v1943_v57 = vperm.slane %v182_v44, 1  ;;  %v1947_v59 = vperm.slane %v183_v47, 1  ;;  %s1810_s17 = smov 101   ;;  %s1741_s18 = sld [smem:[#allocation2 + $0x80]] }
   0xd   :  { %v185_v61 = vperm.slane %v1882_v22, 1  ;;  %v1950_v62 = vperm.slane %v184_v48, 1  ;;  %vm130_vm2 = vcmask 1041408   ;;  %vm132_vm3 = vcmask 1045508   ;;  %s1811_s19 = smov 99   ;;  %s1742_s20 = sld [smem:[#allocation2 + $0x82]] }
   0xe   :  { %v50_v2 = vld.sshfl [vmem:[#allocation1 + $0x10] sm:$0xff pattern:$0x73625140]  ;;  %v48_v3 = vld.sshfl [vmem:[#allocation1] sm:$0xff pattern:$0x73625140] }
   0xf   :  { %66 = vrot.lane.b32.xlu1 %v50_v2, %s1804_s2  ;;  %62 = vrot.lane.b32.xlu0 %v48_v3, %s1804_s2  ;;  %v51_v4 = vld.sshfl [vmem:[#allocation1 + $0x18] sm:$0xff pattern:$0x73625140]  ;;  %v49_v5 = vld.sshfl [vmem:[#allocation1 + $0x8] sm:$0xff pattern:$0x73625140] }
  0x10   :  { %142 = vst [vmem:[#allocation1] ss:$4 sm:$0xff] %v1854_v0  ;;  %v53_v6 = vld.sshfl [vmem:[#allocation1 + $0x28] sm:$0xff pattern:$0x73625140]  ;;  %vm134_vm4 = vcmask 1043456  }
  0x11   :  { %v54_v7 = vld.sshfl [vmem:[#allocation1 + $0x30] sm:$0xff pattern:$0x73625140]  ;;  %v52_v8 = vld.sshfl [vmem:[#allocation1 + $0x20] sm:$0xff pattern:$0x73625140] }
  0x12   :  { %70 = vrot.lane.b32.xlu2 %v52_v8, %s1804_s2  ;;  %144 = vst [vmem:[#allocation1 + $0x20] ss:$4 sm:$0xff] %v1859_v1  ;;  %v181_v8 = vperm.slane %v1892_v25, 1  ;;  %v1978_v30 = vperm.slane %v185_v61, 1  ;;  %vm263_vm5 = vcmp.lt.s32.totalorder %v1894_v26, 1  ;;  %vm351_vm6 = vcmp.lt.s32.totalorder %v1894_v26, 127 }
  0x13   :  { %s2239_s21 = sld [smem:[#allocation2 + $0x81]]  ;;  %vm796_vm7 = vcmp.lt.s32.totalorder %v1894_v26, 29  ;;  %vm897_vm8 = vcmp.lt.s32.totalorder %v1894_v26, 27  ;;  %vm998_vm9 = vcmp.lt.s32.totalorder %v1894_v26, 101  ;;  %vm1099_vm10 = vcmp.lt.s32.totalorder %v1894_v26, 99  ;;  %v1243_v26 = vld [vmem:[%s3356_s3 + $0x278] sm:$0xff] }
  0x14   :  { %s1743_s22 = sld [smem:[#allocation2 + $0x1]]  ;;  %s1812_s25 = smov [#allocation5]   ;;  %vm1709_vm11 = vcmask 254976  }
  0x15   :  { %s1744_s23 = sld [smem:[#allocation2 + $0x101]]  ;;  %s1716_s26 = sshll.u32 %s1812_s25, 4  ;;  %s1717_s26 = int_to_ptr.vmem [resolvable:$true] %s1716_s26 }
  0x16   :  { %s1718_s27 = sshll.u32 %s3359_s6, 4  ;;  %s1719_s27 = int_to_ptr.hbm [resolvable:$true] %s1718_s27 }
  0x17   :  { %68 = vrot.lane.b32.xlu1 %v51_v4, %s1804_s2  ;;  %64 = vrot.lane.b32.xlu0 %v49_v5, %s1804_s2  ;;  %v146_v9 = vld.sshfl [vmem:[#allocation1 + $0x8] sm:$0xff pattern:$0x73625140]  ;;  %v147_v10 = vld.sshfl [vmem:[#allocation1 + $0x10] sm:$0xff pattern:$0x73625140] }
  0x18   :  { %v148_v11 = vld.sshfl [vmem:[#allocation1 + $0x18] sm:$0xff pattern:$0x73625140]  ;;  %v145_v15 = vld.sshfl [vmem:[#allocation1] sm:$0xff pattern:$0x73625140] }
  0x19   :  { %v149_v12 = vld.sshfl [vmem:[#allocation1 + $0x20] sm:$0xff pattern:$0x73625140]  ;;  %v150_v13 = vld.sshfl [vmem:[#allocation1 + $0x28] sm:$0xff pattern:$0x73625140] }
  0x1a   :  { %72 = vrot.lane.b32.xlu2 %v53_v6, %s1804_s2  ;;  %v151_v14 = vld.sshfl [vmem:[#allocation1 + $0x30] sm:$0xff pattern:$0x73625140]  ;;  %v186_v5 = vperm.slane %v1882_v22, 5 }
  0x1f   :  { %74 = vrot.lane.b32.xlu0 %v54_v7, %s1804_s2  ;;  %161 = vrot.lane.b32.xlu1 %v146_v9, %s1805_s0  ;;  %v187_v9 = vperm.slane %v1903_v31, 1 }
  0x21   :  { %v1975_v27 = vperm.slane %v187_v9, 1 }
  0x22   :  { %163 = vrot.lane.b32.xlu2 %v147_v10, %s1805_s0 }
  0x27   :  { %165 = vrot.lane.b32.xlu0 %v148_v11, %s1805_s0  ;;  %167 = vrot.lane.b32.xlu1 %v149_v12, %s1805_s0 }
  0x2a   :  { %169 = vrot.lane.b32.xlu2 %v150_v13, %s1805_s0 }
  0x2f   :  { %171 = vrot.lane.b32.xlu0 %v151_v14, %s1805_s0  ;;  %159 = vrot.lane.b32.xlu1 %v145_v15, %s1805_s0 }
  0x6c   :  { %v71_v18 = vpop.permute.xlu2 %70 }
  0x74   :  { %v73_v23 = vpop.permute.xlu2 %72 }
  0x75   :  { %v80_v40 = vsel %vm78_vm0, %v71_v18, %v73_v23 }
  0x76   :  { %v116_v54 = vmul.f32 %v1910_v36, %v80_v40 }
  0x7c   :  { %v164_v43 = vpop.permute.xlu2 %163 }
  0x81   :  { %v67_v16 = vpop.permute.xlu1 %66  ;;  %v63_v17 = vpop.permute.xlu0 %62 }
  0x84   :  { %v170_v19 = vpop.permute.xlu2 %169 }
  0x89   :  { %v69_v20 = vpop.permute.xlu1 %68  ;;  %v65_v21 = vpop.permute.xlu0 %64 }
  0x8a   :  { %v82_v41 = vsel %vm78_vm0, %v67_v16, %v69_v20  ;;  %v83_v45 = vsel %vm78_vm0, %v65_v21, %v67_v16  ;;  %v84_v46 = vsel %vm78_vm0, %v63_v17, %v65_v21  ;;  %v81_v6 = vsel %vm78_vm0, %v69_v20, %v71_v18 }
  0x8b   :  { %v114_v51 = vmul.f32 %v1912_v37, %v82_v41  ;;  %v112_v55 = vmul.f32 %v1914_v38, %v84_v46  ;;  %v113_v56 = vmul.f32 %v1921_v42, %v83_v45  ;;  %v128_v16 = vrot.slane %v116_v54, 6 }
  0x8c   :  { %v1971_v21 = vperm.slane %v186_v5, 1 }
  0x8d   :  { %v127_v7 = vrot.slane %v114_v51, 2  ;;  %v125_v10 = vrot.slane %v112_v55, 6  ;;  %v126_v11 = vrot.slane %v113_v56, 4 }
  0x8f   :  { %v133_v28 = vsel %vm132_vm3, %v126_v11, %v127_v7 }
  0x91   :  { %v75_v32 = vpop.permute.xlu0 %74  ;;  %v1906_v33 = vpop.permute.xlu1 %161 }
  0x92   :  { %v85_v53 = vsel %vm78_vm0, %v75_v32, %v63_v17  ;;  %v79_v58 = vsel %vm78_vm0, %v73_v23, %v75_v32  ;;  %v178_v13 = vsel %vm173_vm1, %v1906_v33, %v164_v43  ;;  %v115_v17 = vmul.f32 %v1930_v49, %v81_v6 }
  0x93   :  { %v111_v2 = vmul.f32 %v1932_v50, %v85_v53  ;;  %v117_v12 = vmul.f32 %v1935_v52, %v79_v58  ;;  %v203_v20 = vmul.f32 %v1943_v57, %v178_v13  ;;  %v1973_v23 = vperm.slane %v181_v8, 1 }
  0x95   :  { %v131_v18 = vsel %vm130_vm2, %v111_v2, %v125_v10  ;;  %v129_v29 = vrot.slane %v117_v12, 4  ;;  %v216_v47 = vrot.slane %v203_v20, 6 }
  0x96   :  { %v135_v32 = vsel %vm134_vm4, %v131_v18, %v133_v28 }
  0x97   :  { %v140_v55 = vadd.f32 %v135_v32, %v1854_v0 }
  0x99   :  { %v166_v60 = vpop.permute.xlu0 %165  ;;  %v168_v63 = vpop.permute.xlu1 %167 }
  0x9a   :  { %v177_v3 = vsel %vm173_vm1, %v164_v43, %v166_v60  ;;  %v176_v4 = vsel %vm173_vm1, %v166_v60, %v168_v63  ;;  %v175_v35 = vsel %vm173_vm1, %v168_v63, %v170_v19  ;;  %v136_v43 = vsel %vm130_vm2, %v115_v17, %v128_v16 }
  0x9b   :  { %v204_v14 = vmul.f32 %v1947_v59, %v177_v3  ;;  %v205_v15 = vmul.f32 %v1950_v62, %v176_v4  ;;  %v137_v54 = vsel %vm134_vm4, %v136_v43, %v129_v29  ;;  %v206_v56 = vmul.f32 %v1978_v30, %v175_v35 }
  0x9c   :  { %v141_v2 = vadd.f32 %v137_v54, %v1859_v1  ;;  %v272_v43 = vperm.slane %v1892_v25, 6 }
  0x9d   :  { %v217_v34 = vrot.slane %v204_v14, 4  ;;  %v218_v39 = vrot.slane %v205_v15, 2 }
  0x9f   :  { %v222_v58 = vsel %vm132_vm3, %v217_v34, %v218_v39 }
  0xa1   :  { %v172_v40 = vpop.permute.xlu0 %171  ;;  %v160_v41 = vpop.permute.xlu1 %159 }
  0xa2   :  { %v174_v44 = vsel %vm173_vm1, %v170_v19, %v172_v40  ;;  %v179_v45 = vsel %vm173_vm1, %v160_v41, %v1906_v33  ;;  %v180_v46 = vsel %vm173_vm1, %v172_v40, %v160_v41  ;;  %v274_v41 = vperm.slane %v1887_v24, 6 }
  0xa3   :  { %v207_v48 = vmul.f32 %v1971_v21, %v174_v44  ;;  %v202_v51 = vmul.f32 %v1973_v23, %v179_v45  ;;  %v208_v53 = vmul.f32 %v1975_v27, %v180_v46  ;;  %v273_v44 = vperm.slane %v1887_v24, 2 }
  0xa4   :  { %v276_v45 = vperm.slane %v1882_v22, 6 }
  0xa5   :  { %v219_v60 = vrot.slane %v207_v48, 6  ;;  %v220_v33 = vrot.slane %v208_v53, 4  ;;  %v221_v61 = vsel %vm130_vm2, %v202_v51, %v216_v47  ;;  %v271_v47 = vperm.slane %v1892_v25, 2 }
  0xa6   :  { %v223_v63 = vsel %vm134_vm4, %v221_v61, %v222_v58  ;;  %v2031_v48 = vperm.slane %v274_v41, 2  ;;  %v2033_v51 = vperm.slane %v272_v43, 2  ;;  %v275_v61 = vperm.slane %v1882_v22, 2 }
  0xa7   :  { %v224_v3 = vsel %vm130_vm2, %v206_v56, %v219_v60  ;;  %v2002_v4 = vadd.f32 %v223_v63, %v140_v55  ;;  %v2039_v56 = vperm.slane %v273_v44, 2  ;;  %v277_v60 = vperm.slane %v1903_v31, 2 }
  0xa8   :  { %v225_v5 = vsel %vm134_vm4, %v224_v3, %v220_v33  ;;  %v2047_v63 = vperm.slane %v276_v45, 2  ;;  %v361_v3 = vperm.slane %v1887_v24, 3  ;;  %v359_v41 = vperm.slane %v1892_v25, 3 }
  0xa9   :  { %v2005_v6 = vadd.f32 %v225_v5, %v141_v2  ;;  %232 = vst [vmem:[#allocation1] ss:$4 sm:$0xff] %v2002_v4  ;;  %v364_v5 = vperm.slane %v1882_v22, 7 }
  0xab   :  { %234 = vst [vmem:[#allocation1 + $0x20] ss:$4 sm:$0xff] %v2005_v6 }
  0xb0   :  { %v237_v7 = vld.sshfl [vmem:[#allocation1 + $0x10] sm:$0xff pattern:$0x73625140]  ;;  %v236_v8 = vld.sshfl [vmem:[#allocation1 + $0x8] sm:$0xff pattern:$0x73625140] }
  0xb1   :  { %253 = vrot.lane.b32.xlu1 %v237_v7, %s1806_s13  ;;  %251 = vrot.lane.b32.xlu0 %v236_v8, %s1806_s13  ;;  %v235_v9 = vld.sshfl [vmem:[#allocation1] sm:$0xff pattern:$0x73625140]  ;;  %v238_v10 = vld.sshfl [vmem:[#allocation1 + $0x18] sm:$0xff pattern:$0x73625140] }
  0xb2   :  { %249 = vrot.lane.b32.xlu2 %v235_v9, %s1806_s13  ;;  %v240_v11 = vld.sshfl [vmem:[#allocation1 + $0x28] sm:$0xff pattern:$0x73625140]  ;;  %v239_v12 = vld.sshfl [vmem:[#allocation1 + $0x20] sm:$0xff pattern:$0x73625140] }
  0xb3   :  { %320 = vst [vmem:[#allocation1] ss:$4 sm:$0xff] %v2002_v4  ;;  %v241_v13 = vld.sshfl [vmem:[#allocation1 + $0x30] sm:$0xff pattern:$0x73625140]  ;;  %v362_v9 = vperm.slane %v1887_v24, 7 }
  0xb4   :  { %322 = vst [vmem:[#allocation1 + $0x20] ss:$4 sm:$0xff] %v2005_v6  ;;  %v2070_v24 = vperm.slane %v361_v3, 3  ;;  %v2096_v3 = vperm.slane %v359_v41, 3 }
  0xb9   :  { %259 = vrot.lane.b32.xlu1 %v240_v11, %s1806_s13  ;;  %257 = vrot.lane.b32.xlu0 %v239_v12, %s1806_s13  ;;  %v2059_v12 = vperm.slane %v277_v60, 2  ;;  %v365_v60 = vperm.slane %v1903_v31, 3 }
  0xba   :  { %255 = vrot.lane.b32.xlu2 %v238_v10, %s1806_s13  ;;  %v325_v14 = vld.sshfl [vmem:[#allocation1 + $0x10] sm:$0xff pattern:$0x73625140]  ;;  %v324_v15 = vld.sshfl [vmem:[#allocation1 + $0x8] sm:$0xff pattern:$0x73625140] }
  0xbb   :  { %v328_v16 = vld.sshfl [vmem:[#allocation1 + $0x28] sm:$0xff pattern:$0x73625140]  ;;  %v327_v17 = vld.sshfl [vmem:[#allocation1 + $0x20] sm:$0xff pattern:$0x73625140] }
  0xbc   :  { %v326_v18 = vld.sshfl [vmem:[#allocation1 + $0x18] sm:$0xff pattern:$0x73625140]  ;;  %v323_v19 = vld.sshfl [vmem:[#allocation1] sm:$0xff pattern:$0x73625140] }
  0xbd   :  { %v329_v20 = vld.sshfl [vmem:[#allocation1 + $0x30] sm:$0xff pattern:$0x73625140]  ;;  %v2056_v10 = vperm.slane %v271_v47, 2 }
  0xc1   :  { %341 = vrot.lane.b32.xlu1 %v325_v14, %s1807_s14  ;;  %339 = vrot.lane.b32.xlu0 %v324_v15, %s1807_s14  ;;  %v2063_v14 = vperm.slane %v275_v61, 2 }
  0xc2   :  { %261 = vrot.lane.b32.xlu2 %v241_v13, %s1806_s13 }
  0xc9   :  { %347 = vrot.lane.b32.xlu1 %v328_v16, %s1807_s14  ;;  %345 = vrot.lane.b32.xlu0 %v327_v17, %s1807_s14  ;;  %v360_v16 = vperm.slane %v1892_v25, 7 }
  0xca   :  { %343 = vrot.lane.b32.xlu2 %v326_v18, %s1807_s14  ;;  %v2072_v18 = vperm.slane %v364_v5, 3 }
  0xd1   :  { %337 = vrot.lane.b32.xlu0 %v323_v19, %s1807_s14 }
  0xd2   :  { %349 = vrot.lane.b32.xlu2 %v329_v20, %s1807_s14 }
 0x10c   :  { %v250_v28 = vpop.permute.xlu2 %249 }
 0x114   :  { %v256_v29 = vpop.permute.xlu2 %255 }
 0x11c   :  { %v262_v35 = vpop.permute.xlu2 %261 }
 0x11d   :  { %v270_v17 = vsel %vm263_vm5, %v262_v35, %v250_v28 }
 0x11e   :  { %v292_v25 = vmul.f32 %v2056_v10, %v270_v17 }
 0x123   :  { %v254_v32 = vpop.permute.xlu1 %253  ;;  %v252_v34 = vpop.permute.xlu0 %251 }
 0x124   :  { %v344_v46 = vpop.permute.xlu2 %343  ;;  %v267_v55 = vsel %vm263_vm5, %v254_v32, %v256_v29  ;;  %v269_v58 = vsel %vm263_vm5, %v250_v28, %v252_v34  ;;  %v268_v33 = vsel %vm263_vm5, %v252_v34, %v254_v32  ;;  %v2074_v34 = vperm.slane %v362_v9, 3 }
 0x125   :  { %v295_v7 = vmul.f32 %v2031_v48, %v267_v55  ;;  %v293_v8 = vmul.f32 %v2033_v51, %v269_v58  ;;  %v294_v11 = vmul.f32 %v2039_v56, %v268_v33  ;;  %v2082_v55 = vperm.slane %v360_v16, 3 }
 0x127   :  { %v308_v19 = vrot.slane %v295_v7, 2  ;;  %v306_v20 = vrot.slane %v293_v8, 6  ;;  %v307_v43 = vrot.slane %v294_v11, 4 }
 0x129   :  { %v311_v5 = vsel %vm130_vm2, %v292_v25, %v306_v20  ;;  %v312_v31 = vsel %vm132_vm3, %v307_v43, %v308_v19 }
 0x12b   :  { %v260_v39 = vpop.permute.xlu1 %259  ;;  %v258_v40 = vpop.permute.xlu0 %257 }
 0x12c   :  { %v265_v2 = vsel %vm263_vm5, %v258_v40, %v260_v39  ;;  %v264_v13 = vsel %vm263_vm5, %v260_v39, %v262_v35  ;;  %v266_v28 = vsel %vm263_vm5, %v256_v29, %v258_v40  ;;  %v350_v35 = vpop.permute.xlu2 %349  ;;  %v363_v40 = vperm.slane %v1882_v22, 3 }
 0x12d   :  { %v297_v15 = vmul.f32 %v2047_v63, %v265_v2  ;;  %v298_v44 = vmul.f32 %v2059_v12, %v264_v13  ;;  %v296_v61 = vmul.f32 %v2063_v14, %v266_v28  ;;  %v2104_v22 = vperm.slane %v365_v60, 3 }
 0x12e   :  { %v2106_v11 = vperm.slane %v363_v40, 3  ;;  %v313_v13 = vsel %vm134_vm4, %v311_v5, %v312_v31 }
 0x12f   :  { %v309_v47 = vrot.slane %v297_v15, 6  ;;  %v310_v7 = vrot.slane %v298_v44, 4 }
 0x133   :  { %v342_v53 = vpop.permute.xlu1 %341  ;;  %v2035_v54 = vpop.permute.xlu0 %339 }
 0x134   :  { %v355_v33 = vsel %vm351_vm6, %v342_v53, %v344_v46  ;;  %v356_v29 = vsel %vm351_vm6, %v2035_v54, %v342_v53 }
 0x135   :  { %v382_v9 = vmul.f32 %v2070_v24, %v355_v33  ;;  %v381_v53 = vmul.f32 %v2082_v55, %v356_v29 }
 0x137   :  { %v395_v44 = vrot.slane %v382_v9, 4  ;;  %v394_v28 = vrot.slane %v381_v53, 6 }
 0x13b   :  { %v348_v32 = vpop.permute.xlu1 %347  ;;  %v346_v39 = vpop.permute.xlu0 %345 }
 0x13c   :  { %v354_v45 = vsel %vm351_vm6, %v344_v46, %v346_v39  ;;  %v352_v58 = vsel %vm351_vm6, %v348_v32, %v350_v35  ;;  %v314_v46 = vsel %vm130_vm2, %v296_v61, %v309_v47  ;;  %v353_v15 = vsel %vm351_vm6, %v346_v39, %v348_v32 }
 0x13d   :  { %v383_v2 = vmul.f32 %v2074_v34, %v354_v45  ;;  %v385_v8 = vmul.f32 %v2072_v18, %v352_v58  ;;  %v315_v19 = vsel %vm134_vm4, %v314_v46, %v310_v7  ;;  %v384_v32 = vmul.f32 %v2106_v11, %v353_v15 }
 0x13e   :  { %v318_v39 = vadd.f32 %v313_v13, %v2002_v4 }
 0x13f   :  { %v396_v16 = vrot.slane %v383_v2, 2  ;;  %v397_v20 = vrot.slane %v385_v8, 6 }
 0x141   :  { %v400_v58 = vsel %vm132_vm3, %v395_v44, %v396_v16  ;;  %v402_v33 = vsel %vm130_vm2, %v384_v32, %v397_v20 }
 0x143   :  { %v338_v17 = vpop.permute.xlu0 %337 }
 0x144   :  { %v357_v41 = vsel %vm351_vm6, %v338_v17, %v2035_v54  ;;  %v358_v43 = vsel %vm351_vm6, %v350_v35, %v338_v17  ;;  %v319_v54 = vadd.f32 %v315_v19, %v2005_v6 }
 0x145   :  { %v380_v45 = vmul.f32 %v2096_v3, %v357_v41  ;;  %v386_v47 = vmul.f32 %v2104_v22, %v358_v43 }
 0x147   :  { %v398_v60 = vrot.slane %v386_v47, 4  ;;  %v399_v25 = vsel %vm130_vm2, %v380_v45, %v394_v28 }
 0x148   :  { %v401_v35 = vsel %vm134_vm4, %v399_v25, %v400_v58 }
 0x149   :  { %v403_v29 = vsel %vm134_vm4, %v402_v33, %v398_v60  ;;  %v406_v40 = vadd.f32 %v401_v35, %v318_v39 }
 0x14a   :  { %v407_v61 = vadd.f32 %v403_v29, %v319_v54 }
 0x14b   :  { %v2127_v2 = vmul.f32 0.11111111, %v406_v40 }
 0x14c   :  { %v2129_v5 = vmul.f32 0.11111111, %v407_v61 }
 0x14d   :  { %465 = vst [vmem:[#allocation1] ss:$4 sm:$0xff] %v2127_v2 }
 0x14e   :  { %467 = vst [vmem:[#allocation1 + $0x20] ss:$4 sm:$0xff] %v2129_v5 }
 0x154   :  { %v470_v4 = vld.sshfl [vmem:[#allocation1 + $0x10] sm:$0xff pattern:$0x73625140]  ;;  %v469_v31 = vld.sshfl [vmem:[#allocation1 + $0x8] sm:$0xff pattern:$0x73625140] }
 0x155   :  { %486 = vrot.lane.b32.xlu0 %v470_v4, %s1806_s13  ;;  %484 = vrot.lane.b32.xlu2 %v469_v31, %s1806_s13  ;;  %v468_v6 = vld.sshfl [vmem:[#allocation1] sm:$0xff pattern:$0x73625140]  ;;  %v474_v7 = vld.sshfl [vmem:[#allocation1 + $0x30] sm:$0xff pattern:$0x73625140] }
 0x156   :  { %482 = vrot.lane.b32.xlu1 %v468_v6, %s1806_s13  ;;  %v471_v8 = vld.sshfl [vmem:[#allocation1 + $0x18] sm:$0xff pattern:$0x73625140]  ;;  %v473_v46 = vld.sshfl [vmem:[#allocation1 + $0x28] sm:$0xff pattern:$0x73625140] }
 0x157   :  { %540 = vst [vmem:[#allocation1] ss:$4 sm:$0xff] %v2127_v2  ;;  %v472_v9 = vld.sshfl [vmem:[#allocation1 + $0x20] sm:$0xff pattern:$0x73625140] }
 0x158   :  { %542 = vst [vmem:[#allocation1 + $0x20] ss:$4 sm:$0xff] %v2129_v5 }
 0x15d   :  { %494 = vrot.lane.b32.xlu2 %v474_v7, %s1806_s13 }
 0x15e   :  { %488 = vrot.lane.b32.xlu1 %v471_v8, %s1806_s13  ;;  %v544_v53 = vld.sshfl [vmem:[#allocation1 + $0x8] sm:$0xff pattern:$0x73625140]  ;;  %v546_v13 = vld.sshfl [vmem:[#allocation1 + $0x18] sm:$0xff pattern:$0x73625140] }
 0x15f   :  { %559 = vrot.lane.b32.xlu0 %v544_v53, %s1807_s14  ;;  %v547_v15 = vld.sshfl [vmem:[#allocation1 + $0x20] sm:$0xff pattern:$0x73625140]  ;;  %v545_v16 = vld.sshfl [vmem:[#allocation1 + $0x10] sm:$0xff pattern:$0x73625140] }
 0x160   :  { %v549_v17 = vld.sshfl [vmem:[#allocation1 + $0x30] sm:$0xff pattern:$0x73625140]  ;;  %v548_v19 = vld.sshfl [vmem:[#allocation1 + $0x28] sm:$0xff pattern:$0x73625140] }
 0x161   :  { %617 = vst [vmem:[#allocation1 + $0x20] ss:$4 sm:$0xff] %v2129_v5  ;;  %v543_v20 = vld.sshfl [vmem:[#allocation1] sm:$0xff pattern:$0x73625140] }
 0x162   :  { %615 = vst [vmem:[#allocation1] ss:$4 sm:$0xff] %v2127_v2 }
 0x165   :  { %492 = vrot.lane.b32.xlu2 %v473_v46, %s1806_s13 }
 0x166   :  { %490 = vrot.lane.b32.xlu1 %v472_v9, %s1806_s13 }
 0x167   :  { %565 = vrot.lane.b32.xlu0 %v547_v15, %s1807_s14 }
 0x168   :  { %v624_v41 = vld.sshfl [vmem:[#allocation1 + $0x30] sm:$0xff pattern:$0x73625140]  ;;  %v623_v43 = vld.sshfl [vmem:[#allocation1 + $0x28] sm:$0xff pattern:$0x73625140] }
 0x169   :  { %v619_v44 = vld.sshfl [vmem:[#allocation1 + $0x8] sm:$0xff pattern:$0x73625140]  ;;  %v620_v28 = vld.sshfl [vmem:[#allocation1 + $0x10] sm:$0xff pattern:$0x73625140] }
 0x16a   :  { %v618_v45 = vld.sshfl [vmem:[#allocation1] sm:$0xff pattern:$0x73625140]  ;;  %v621_v32 = vld.sshfl [vmem:[#allocation1 + $0x18] sm:$0xff pattern:$0x73625140] }
 0x16b   :  { %v622_v47 = vld.sshfl [vmem:[#allocation1 + $0x20] sm:$0xff pattern:$0x73625140]  ;;  %690 = vst [vmem:[#allocation1] ss:$4 sm:$0xff] %v2127_v2 }
 0x16c   :  { %692 = vst [vmem:[#allocation1 + $0x20] ss:$4 sm:$0xff] %v2129_v5 }
 0x16d   :  { %563 = vrot.lane.b32.xlu2 %v546_v13, %s1807_s14 }
 0x16e   :  { %561 = vrot.lane.b32.xlu1 %v545_v16, %s1807_s14 }
 0x16f   :  { %569 = vrot.lane.b32.xlu0 %v549_v17, %s1807_s14 }
 0x172   :  { %v696_v60 = vld.sshfl [vmem:[#allocation1 + $0x18] sm:$0xff pattern:$0x73625140]  ;;  %v695_v25 = vld.sshfl [vmem:[#allocation1 + $0x10] sm:$0xff pattern:$0x73625140] }
 0x173   :  { %v697_v39 = vld.sshfl [vmem:[#allocation1 + $0x20] sm:$0xff pattern:$0x73625140]  ;;  %v698_v58 = vld.sshfl [vmem:[#allocation1 + $0x28] sm:$0xff pattern:$0x73625140] }
 0x174   :  { %v694_v54 = vld.sshfl [vmem:[#allocation1 + $0x8] sm:$0xff pattern:$0x73625140]  ;;  %v693_v33 = vld.sshfl [vmem:[#allocation1] sm:$0xff pattern:$0x73625140] }
 0x175   :  { %567 = vrot.lane.b32.xlu2 %v548_v19, %s1807_s14  ;;  %765 = vst [vmem:[#allocation1] ss:$4 sm:$0xff] %v2127_v2  ;;  %v699_v35 = vld.sshfl [vmem:[#allocation1 + $0x30] sm:$0xff pattern:$0x73625140] }
 0x176   :  { %557 = vrot.lane.b32.xlu1 %v543_v20, %s1807_s14  ;;  %767 = vst [vmem:[#allocation1 + $0x20] ss:$4 sm:$0xff] %v2129_v5 }
 0x177   :  { %634 = vrot.lane.b32.xlu0 %v619_v44, %s1804_s2 }
 0x17c   :  { %v768_v29 = vld.sshfl [vmem:[#allocation1] sm:$0xff pattern:$0x73625140]  ;;  %v771_v40 = vld.sshfl [vmem:[#allocation1 + $0x18] sm:$0xff pattern:$0x73625140] }
 0x17d   :  { %632 = vrot.lane.b32.xlu2 %v618_v45, %s1804_s2  ;;  %v770_v61 = vld.sshfl [vmem:[#allocation1 + $0x10] sm:$0xff pattern:$0x73625140]  ;;  %v769_v4 = vld.sshfl [vmem:[#allocation1 + $0x8] sm:$0xff pattern:$0x73625140] }
 0x17e   :  { %636 = vrot.lane.b32.xlu1 %v620_v28, %s1804_s2  ;;  %866 = vst [vmem:[#allocation1] ss:$4 sm:$0xff] %v2127_v2  ;;  %v774_v31 = vld.sshfl [vmem:[#allocation1 + $0x30] sm:$0xff pattern:$0x73625140] }
 0x17f   :  { %644 = vrot.lane.b32.xlu0 %v624_v41, %s1804_s2  ;;  %v773_v6 = vld.sshfl [vmem:[#allocation1 + $0x28] sm:$0xff pattern:$0x73625140]  ;;  %v772_v7 = vld.sshfl [vmem:[#allocation1 + $0x20] sm:$0xff pattern:$0x73625140] }
 0x180   :  { %868 = vst [vmem:[#allocation1 + $0x20] ss:$4 sm:$0xff] %v2129_v5 }
 0x185   :  { %638 = vrot.lane.b32.xlu2 %v621_v32, %s1804_s2  ;;  %v871_v8 = vld.sshfl [vmem:[#allocation1 + $0x10] sm:$0xff pattern:$0x73625140]  ;;  %v870_v46 = vld.sshfl [vmem:[#allocation1 + $0x8] sm:$0xff pattern:$0x73625140] }
 0x186   :  { %642 = vrot.lane.b32.xlu1 %v623_v43, %s1804_s2  ;;  %v869_v9 = vld.sshfl [vmem:[#allocation1] sm:$0xff pattern:$0x73625140]  ;;  %v872_v53 = vld.sshfl [vmem:[#allocation1 + $0x18] sm:$0xff pattern:$0x73625140] }
 0x187   :  { %640 = vrot.lane.b32.xlu0 %v622_v47, %s1804_s2  ;;  %v2164_v13 = vld.sshfl [vmem:[#allocation1 + $0x28] sm:$0xff pattern:$0x73625140]  ;;  %v873_v15 = vld.sshfl [vmem:[#allocation1 + $0x20] sm:$0xff pattern:$0x73625140] }
 0x188   :  { %967 = vst [vmem:[#allocation1] ss:$4 sm:$0xff] %v2127_v2  ;;  %v875_v16 = vld.sshfl [vmem:[#allocation1 + $0x30] sm:$0xff pattern:$0x73625140] }
 0x189   :  { %969 = vst [vmem:[#allocation1 + $0x20] ss:$4 sm:$0xff] %v2129_v5 }
 0x18d   :  { %711 = vrot.lane.b32.xlu2 %v695_v25, %s1805_s0 }
 0x18e   :  { %709 = vrot.lane.b32.xlu1 %v694_v54, %s1805_s0 }
 0x18f   :  { %713 = vrot.lane.b32.xlu0 %v696_v60, %s1805_s0  ;;  %v972_v17 = vld.sshfl [vmem:[#allocation1 + $0x10] sm:$0xff pattern:$0x73625140]  ;;  %v971_v19 = vld.sshfl [vmem:[#allocation1 + $0x8] sm:$0xff pattern:$0x73625140] }
 0x190   :  { %v2171_v20 = vld.sshfl [vmem:[#allocation1 + $0x28] sm:$0xff pattern:$0x73625140]  ;;  %v2173_v41 = vld.sshfl [vmem:[#allocation1 + $0x30] sm:$0xff pattern:$0x73625140] }
 0x191   :  { %v974_v43 = vld.sshfl [vmem:[#allocation1 + $0x20] sm:$0xff pattern:$0x73625140]  ;;  %v973_v28 = vld.sshfl [vmem:[#allocation1 + $0x18] sm:$0xff pattern:$0x73625140] }
 0x192   :  { %v970_v44 = vld.sshfl [vmem:[#allocation1] sm:$0xff pattern:$0x73625140]  ;;  %1070 = vst [vmem:[#allocation1 + $0x20] ss:$4 sm:$0xff] %v2129_v5 }
 0x193   :  { %1068 = vst [vmem:[#allocation1] ss:$4 sm:$0xff] %v2127_v2 }
 0x195   :  { %707 = vrot.lane.b32.xlu2 %v693_v33, %s1805_s0 }
 0x196   :  { %715 = vrot.lane.b32.xlu1 %v697_v39, %s1805_s0 }
 0x197   :  { %782 = vrot.lane.b32.xlu0 %v768_v29, %s1808_s15 }
 0x19d   :  { %719 = vrot.lane.b32.xlu2 %v699_v35, %s1805_s0 }
 0x19e   :  { %717 = vrot.lane.b32.xlu1 %v698_v58, %s1805_s0  ;;  %v1072_v58 = vld.sshfl [vmem:[#allocation1 + $0x8] sm:$0xff pattern:$0x73625140]  ;;  %s2509_s0 = sld [smem:[#allocation2]] }
 0x19f   :  { %788 = vrot.lane.b32.xlu0 %v771_v40, %s1808_s15 }
 0x1a5   :  { %786 = vrot.lane.b32.xlu2 %v770_v61, %s1808_s15 }
 0x1a6   :  { %784 = vrot.lane.b32.xlu1 %v769_v4, %s1808_s15  ;;  %v510_v4 = vstv %s1741_s18  ;;  %s2732_s18 = sld [smem:[#allocation2 + $0x2]] }
 0x1a7   :  { %794 = vrot.lane.b32.xlu0 %v774_v31, %s1808_s15 }
 0x1ad   :  { %792 = vrot.lane.b32.xlu2 %v773_v6, %s1808_s15 }
 0x1ae   :  { %790 = vrot.lane.b32.xlu1 %v772_v7, %s1808_s15 }
 0x1af   :  { %887 = vrot.lane.b32.xlu0 %v871_v8, %s1809_s16  ;;  %v485_v45 = vpop.permute.xlu2 %484 }
 0x1b5   :  { %885 = vrot.lane.b32.xlu2 %v870_v46, %s1809_s16  ;;  %v1075_v46 = vld.sshfl [vmem:[#allocation1 + $0x20] sm:$0xff pattern:$0x73625140] }
 0x1b6   :  { %883 = vrot.lane.b32.xlu1 %v869_v9, %s1809_s16 }
 0x1b7   :  { %891 = vrot.lane.b32.xlu0 %v873_v15, %s1809_s16  ;;  %v495_v47 = vpop.permute.xlu2 %494 }
 0x1bd   :  { %986 = vrot.lane.b32.xlu2 %v971_v19, %s1810_s17  ;;  %v1074_v19 = vld.sshfl [vmem:[#allocation1 + $0x18] sm:$0xff pattern:$0x73625140] }
 0x1be   :  { %889 = vrot.lane.b32.xlu1 %v872_v53, %s1809_s16 }
 0x1bf   :  { %988 = vrot.lane.b32.xlu0 %v972_v17, %s1810_s17  ;;  %v493_v32 = vpop.permute.xlu2 %492 }
 0x1c0   :  { %v496_v39 = vsel %vm263_vm5, %v493_v32, %v495_v47 }
 0x1c5   :  { %992 = vrot.lane.b32.xlu2 %v974_v43, %s1810_s17  ;;  %v1073_v43 = vld.sshfl [vmem:[#allocation1 + $0x10] sm:$0xff pattern:$0x73625140] }
 0x1c6   :  { %895 = vrot.lane.b32.xlu1 %v875_v16, %s1809_s16 }
 0x1c7   :  { %1087 = vrot.lane.b32.xlu0 %v1072_v58, %s1811_s19  ;;  %v487_v60 = vpop.permute.xlu0 %486  ;;  %v564_v25 = vpop.permute.xlu2 %563 }
 0x1c8   :  { %v500_v54 = vsel %vm263_vm5, %v485_v45, %v487_v60  ;;  %v483_v33 = vpop.permute.xlu1 %482 }
 0x1c9   :  { %v501_v35 = vsel %vm263_vm5, %v483_v33, %v485_v45  ;;  %v502_v29 = vsel %vm263_vm5, %v495_v47, %v483_v33  ;;  %v505_v6 = vmul.f32 %v500_v54, %v2039_v56  ;;  %v1071_v45 = vld.sshfl [vmem:[#allocation1] sm:$0xff pattern:$0x73625140]  ;;  %v509_v47 = vmul.f32 %v496_v39, %v2059_v12 }
 0x1ca   :  { %v503_v40 = vmul.f32 %v502_v29, %v2056_v10  ;;  %v504_v61 = vmul.f32 %v501_v35, %v2033_v51 }
 0x1cb   :  { %v513_v16 = vmul.f32 %v510_v4, %v505_v6 }
 0x1cc   :  { %v512_v31 = vmul.f32 %v510_v4, %v504_v61  ;;  %v511_v7 = vmul.f32 %v510_v4, %v503_v40  ;;  %v517_v61 = vmul.f32 %v510_v4, %v509_v47 }
 0x1cd   :  { %984 = vrot.lane.b32.xlu2 %v970_v44, %s1810_s17  ;;  %v526_v44 = vrot.slane %v513_v16, 4 }
 0x1ce   :  { %v525_v8 = vrot.slane %v512_v31, 6  ;;  %990 = vrot.lane.b32.xlu1 %v973_v28, %s1810_s17 }
 0x1cf   :  { %1093 = vrot.lane.b32.xlu0 %v1075_v46, %s1811_s19  ;;  %v568_v9 = vpop.permute.xlu2 %567 }
 0x1d0   :  { %v530_v53 = vsel %vm130_vm2, %v511_v7, %v525_v8  ;;  %v489_v15 = vpop.permute.xlu1 %488 }
 0x1d1   :  { %v499_v51 = vsel %vm263_vm5, %v487_v60, %v489_v15  ;;  %v2208_v10 = vpop.permute.xlu0 %559 }
 0x1d2   :  { %v506_v17 = vmul.f32 %v499_v51, %v2031_v48 }
 0x1d4   :  { %v514_v56 = vmul.f32 %v510_v4, %v506_v17 }
 0x1d5   :  { %1091 = vrot.lane.b32.xlu2 %v1074_v19, %s1811_s19 }
 0x1d6   :  { %v527_v28 = vrot.slane %v514_v56, 2  ;;  %1089 = vrot.lane.b32.xlu1 %v1073_v43, %s1811_s19 }
 0x1d7   :  { %1085 = vrot.lane.b32.xlu0 %v1071_v45, %s1811_s19  ;;  %v2215_v58 = vpop.permute.xlu2 %632 }
 0x1d8   :  { %v531_v60 = vsel %vm132_vm3, %v526_v44, %v527_v28  ;;  %v491_v48 = vpop.permute.xlu1 %490  ;;  %v1076_v28 = vld.sshfl [vmem:[#allocation1 + $0x28] sm:$0xff pattern:$0x73625140] }
 0x1d9   :  { %v532_v54 = vsel %vm134_vm4, %v530_v53, %v531_v60  ;;  %v497_v33 = vsel %vm263_vm5, %v491_v48, %v493_v32  ;;  %v498_v35 = vsel %vm263_vm5, %v489_v15, %v491_v48  ;;  %v566_v29 = vpop.permute.xlu0 %565  ;;  %v459_v48 = vstv %s2239_s21  ;;  %s2746_s21 = sld [smem:[#allocation2 + $0x100]] }
 0x1da   :  { %v507_v40 = vmul.f32 %v498_v35, %v2063_v14  ;;  %v508_v12 = vmul.f32 %v497_v33, %v2047_v63  ;;  %v572_v39 = vsel %vm351_vm6, %v566_v29, %v568_v9  ;;  %v573_v31 = vsel %vm351_vm6, %v564_v25, %v566_v29 }
 0x1db   :  { %v581_v8 = vmul.f32 %v573_v31, %v2074_v34  ;;  %v529_v14 = vrot.slane %v517_v61, 4  ;;  %v585_v63 = vstv %s1742_s20  ;;  %v582_v17 = vmul.f32 %v572_v39, %v2106_v11 }
 0x1dc   :  { %v516_v6 = vmul.f32 %v510_v4, %v508_v12  ;;  %v515_v32 = vmul.f32 %v510_v4, %v507_v40  ;;  %v460_v31 = vmul.f32 %v459_v48, %v2127_v2 }
 0x1dd   :  { %994 = vrot.lane.b32.xlu2 %v2171_v20, %s1810_s17  ;;  %v589_v51 = vmul.f32 %v585_v63, %v581_v8  ;;  %v461_v8 = vmul.f32 %v459_v48, %v2129_v5 }
 0x1de   :  { %v528_v7 = vrot.slane %v516_v6, 6  ;;  %893 = vrot.lane.b32.xlu1 %v2164_v13, %s1809_s16 }
 0x1df   :  { %996 = vrot.lane.b32.xlu0 %v2173_v41, %s1810_s17  ;;  %v2236_v46 = vpop.permute.xlu2 %638  ;;  %v602_v45 = vrot.slane %v589_v51, 2 }
 0x1e0   :  { %v533_v53 = vsel %vm130_vm2, %v515_v32, %v528_v7  ;;  %v562_v15 = vpop.permute.xlu1 %561 }
 0x1e1   :  { %v534_v20 = vsel %vm134_vm4, %v533_v53, %v529_v14  ;;  %v574_v34 = vsel %vm351_vm6, %v562_v15, %v564_v25  ;;  %v575_v13 = vsel %vm351_vm6, %v2208_v10, %v562_v15  ;;  %v570_v4 = vpop.permute.xlu0 %569  ;;  %v1077_v25 = vld.sshfl [vmem:[#allocation1 + $0x30] sm:$0xff pattern:$0x73625140]  ;;  %v537_v14 = vadd.f32 %v532_v54, %v460_v31 }
 0x1e2   :  { %v580_v41 = vmul.f32 %v574_v34, %v2070_v24  ;;  %v571_v16 = vsel %vm351_vm6, %v568_v9, %v570_v4  ;;  %v579_v19 = vmul.f32 %v575_v13, %v2082_v55  ;;  %v590_v24 = vmul.f32 %v585_v63, %v582_v17 }
 0x1e3   :  { %v583_v56 = vmul.f32 %v571_v16, %v2072_v18  ;;  %v538_v34 = vadd.f32 %v534_v20, %v461_v8 }
 0x1e4   :  { %v588_v43 = vmul.f32 %v585_v63, %v580_v41  ;;  %v587_v11 = vmul.f32 %v585_v63, %v579_v19 }
 0x1e5   :  { %v591_v44 = vmul.f32 %v585_v63, %v583_v56  ;;  %1097 = vrot.lane.b32.xlu2 %v1077_v25, %s1811_s19 }
 0x1e6   :  { %v601_v47 = vrot.slane %v588_v43, 4  ;;  %1095 = vrot.lane.b32.xlu1 %v1076_v28, %s1811_s19  ;;  %v600_v6 = vrot.slane %v587_v11, 6 }
 0x1e7   :  { %v603_v9 = vrot.slane %v591_v44, 6  ;;  %v2255_v60 = vpop.permute.xlu2 %711 }
 0x1e8   :  { %v606_v18 = vsel %vm132_vm3, %v601_v47, %v602_v45  ;;  %v558_v55 = vpop.permute.xlu1 %557 }
 0x1e9   :  { %v608_v33 = vsel %vm130_vm2, %v590_v24, %v603_v9  ;;  %v576_v35 = vsel %vm351_vm6, %v558_v55, %v2208_v10  ;;  %v577_v29 = vsel %vm351_vm6, %v570_v4, %v558_v55  ;;  %v635_v40 = vpop.permute.xlu0 %634 }
 0x1ea   :  { %v578_v12 = vmul.f32 %v576_v35, %v2096_v3  ;;  %v584_v39 = vmul.f32 %v577_v29, %v2104_v22  ;;  %v651_v61 = vsel %vm78_vm0, %v2215_v58, %v635_v40  ;;  %v660_v3 = vstv %s1743_s22 }
 0x1eb   :  { %v654_v10 = vmul.f32 %v651_v61, %v1914_v38 }
 0x1ec   :  { %v586_v32 = vmul.f32 %v585_v63, %v578_v12  ;;  %v592_v7 = vmul.f32 %v585_v63, %v584_v39 }
 0x1ed   :  { %v662_v16 = vmul.f32 %v660_v3, %v654_v10  ;;  %v1291_v10 = vld [vmem:[%s3357_s4 + $0x78] sm:$0xff] }
 0x1ee   :  { %v604_v53 = vrot.slane %v592_v7, 4  ;;  %v605_v15 = vsel %vm130_vm2, %v586_v32, %v600_v6  ;;  %1407 = vmatpush.msra.mxu0 %v1291_v10  ;;  %v1301_v10 = vld [vmem:[%s3357_s4 + $0xc8] sm:$0xff] }
 0x1ef   :  { %v607_v22 = vsel %vm134_vm4, %v605_v15, %v606_v18  ;;  %v708_v13 = vpop.permute.xlu2 %707  ;;  %v675_v25 = vrot.slane %v662_v16, 6 }
 0x1f0   :  { %v609_v4 = vsel %vm134_vm4, %v608_v33, %v604_v53  ;;  %v612_v51 = vadd.f32 %v607_v22, %v537_v14  ;;  %v637_v2 = vpop.permute.xlu1 %636  ;;  %v1323_v14 = vld [vmem:[%s3357_s4 + $0x178] sm:$0xff]  ;;  %v1290_v53 = vld [vmem:[%s3357_s4 + $0x70] sm:$0xff] }
 0x1f1   :  { %v613_v41 = vadd.f32 %v609_v4, %v538_v34  ;;  %v649_v5 = vsel %vm78_vm0, %v637_v2, %v2236_v46  ;;  %v650_v38 = vsel %vm78_vm0, %v635_v40, %v637_v2  ;;  %v645_v54 = vpop.permute.xlu0 %644  ;;  %1447 = vmatpush.msra.mxu2 %v1323_v14  ;;  %v1307_v34 = vld [vmem:[%s3357_s4 + $0xf8] sm:$0xff]  ;;  %v1322_v22 = vld [vmem:[%s3357_s4 + $0x170] sm:$0xff]  ;;  %1408 = vmatpush.msra.mxu0 %v1290_v53  ;;  %v1316_v14 = vld [vmem:[%s3357_s4 + $0x140] sm:$0xff] }
 0x1f2   :  { %v655_v63 = vmul.f32 %v650_v38, %v1921_v42  ;;  %v656_v20 = vmul.f32 %v649_v5, %v1912_v37  ;;  %v652_v17 = vsel %vm78_vm0, %v645_v54, %v2215_v58  ;;  %1427 = vmatpush.msra.mxu1 %v1307_v34  ;;  %v1283_v34 = vld [vmem:[%s3357_s4 + $0x38] sm:$0xff] }
 0x1f3   :  { %v653_v56 = vmul.f32 %v652_v17, %v1932_v50  ;;  %1448 = vmatpush.msra.mxu2 %v1322_v22  ;;  %v1321_v17 = vld [vmem:[%s3357_s4 + $0x168] sm:$0xff]  ;;  %v1300_v22 = vld [vmem:[%s3357_s4 + $0xc0] sm:$0xff] }
 0x1f4   :  { %v663_v19 = vmul.f32 %v660_v3, %v655_v63  ;;  %v664_v43 = vmul.f32 %v660_v3, %v656_v20  ;;  %v1289_v20 = vld [vmem:[%s3357_s4 + $0x68] sm:$0xff] }
 0x1f5   :  { %v661_v44 = vmul.f32 %v660_v3, %v653_v56  ;;  %1409 = vmatpush.msra.mxu0 %v1289_v20  ;;  %v1338_v56 = vld [vmem:[%s3357_s4 + $0x1f0] sm:$0xff]  ;;  %1449 = vmatpush.msra.mxu2 %v1321_v17  ;;  %v1331_v17 = vld [vmem:[%s3357_s4 + $0x1b8] sm:$0xff] }
 0x1f6   :  { %v676_v28 = vrot.slane %v663_v19, 4  ;;  %v677_v45 = vrot.slane %v664_v43, 2  ;;  %v1305_v19 = vld [vmem:[%s3357_s4 + $0xe8] sm:$0xff] }
 0x1f7   :  { %v680_v47 = vsel %vm130_vm2, %v661_v44, %v675_v25  ;;  %v2288_v24 = vpop.permute.xlu2 %719  ;;  %v1320_v25 = vld [vmem:[%s3357_s4 + $0x160] sm:$0xff]  ;;  %v1337_v44 = vld [vmem:[%s3357_s4 + $0x1e8] sm:$0xff] }
 0x1f8   :  { %v681_v42 = vsel %vm132_vm3, %v676_v28, %v677_v45  ;;  %v643_v9 = vpop.permute.xlu1 %642  ;;  %v2294_v37 = vsel %vm173_vm1, %v2288_v24, %v708_v13  ;;  %v1287_v28 = vld [vmem:[%s3357_s4 + $0x58] sm:$0xff]  ;;  %1450 = vmatpush.msra.mxu2 %v1320_v25 }
 0x1f9   :  { %v682_v50 = vsel %vm134_vm4, %v680_v47, %v681_v42  ;;  %v646_v58 = vsel %vm78_vm0, %v643_v9, %v645_v54  ;;  %v641_v11 = vpop.permute.xlu0 %640  ;;  %v1304_v47 = vld [vmem:[%s3357_s4 + $0xe0] sm:$0xff]  ;;  %v1319_v42 = vld [vmem:[%s3357_s4 + $0x158] sm:$0xff] }
 0x1fa   :  { %v2299_v18 = vadd.f32 %v682_v50, %v612_v51  ;;  %v659_v55 = vmul.f32 %v646_v58, %v1935_v52  ;;  %v647_v48 = vsel %vm78_vm0, %v641_v11, %v643_v9  ;;  %v648_v33 = vsel %vm78_vm0, %v2236_v46, %v641_v11  ;;  %v1336_v9 = vld [vmem:[%s3357_s4 + $0x1e0] sm:$0xff]  ;;  %v1286_v11 = vld [vmem:[%s3357_s4 + $0x50] sm:$0xff]  ;;  %1451 = vmatpush.msra.mxu2 %v1319_v42 }
 0x1fb   :  { %v657_v35 = vmul.f32 %v648_v33, %v1930_v49  ;;  %v658_v29 = vmul.f32 %v647_v48, %v1910_v36  ;;  %v734_v48 = vmul.f32 %v2294_v37, %v1975_v27  ;;  %v2405_v33 = vld [vmem:[%s3354_s1 + $0x18] sm:$0xf]  ;;  %v1285_v37 = vld [vmem:[%s3357_s4 + $0x48] sm:$0xff]  ;;  %v1330_v42 = vld [vmem:[%s3357_s4 + $0x1b0] sm:$0xff] }
 0x1fc   :  { %v667_v40 = vmul.f32 %v660_v3, %v659_v55  ;;  %v1303_v55 = vld [vmem:[%s3357_s4 + $0xd8] sm:$0xff] }
 0x1fd   :  { %v666_v12 = vmul.f32 %v660_v3, %v658_v29  ;;  %v665_v61 = vmul.f32 %v660_v3, %v657_v35  ;;  %v2329_v3 = vstv %s1744_s23  ;;  %v1731_v35 = vrot.slane %v2405_v33, 10  ;;  %v1318_v29 = vld [vmem:[%s3357_s4 + $0x150] sm:$0xff]  ;;  %v1335_v27 = vld [vmem:[%s3357_s4 + $0x1d8] sm:$0xff] }
 0x1fe   :  { %v679_v39 = vrot.slane %v667_v40, 4  ;;  %1452 = vmatpush.msra.mxu2 %v1318_v29  ;;  %v2545_v29 = vld [vmem:[%s3354_s1 + $0x8] sm:$0xff] }
 0x1ff   :  { %v678_v31 = vrot.slane %v666_v12, 6 }
 0x200   :  { %v710_v6 = vpop.permute.xlu1 %709 }
 0x201   :  { %v683_v52 = vsel %vm130_vm2, %v665_v61, %v678_v31  ;;  %v714_v32 = vpop.permute.xlu0 %713  ;;  %v725_v7 = vsel %vm173_vm1, %v710_v6, %v2255_v60  ;;  %v726_v46 = vsel %vm173_vm1, %v708_v13, %v710_v6  ;;  %v1339_v13 = vld [vmem:[%s3357_s4 + $0x1f8] sm:$0xff] }
 0x202   :  { %v684_v49 = vsel %vm134_vm4, %v683_v52, %v679_v39  ;;  %v728_v36 = vmul.f32 %v726_v46, %v1973_v23  ;;  %v729_v8 = vmul.f32 %v725_v7, %v1943_v57  ;;  %v724_v57 = vsel %vm173_vm1, %v2255_v60, %v714_v32  ;;  %v2334_v23 = vpop.permute.xlu2 %786  ;;  %1467 = vmatpush.msra.mxu3 %v1339_v13  ;;  %v1302_v52 = vld [vmem:[%s3357_s4 + $0xd0] sm:$0xff]  ;;  %v1315_v13 = vld [vmem:[%s3357_s4 + $0x138] sm:$0xff] }
 0x203   :  { %v2327_v15 = vadd.f32 %v684_v49, %v613_v41  ;;  %v730_v60 = vmul.f32 %v724_v57, %v1947_v59  ;;  %v1306_v59 = vld [vmem:[%s3357_s4 + $0xf0] sm:$0xff]  ;;  %v1333_v57 = vld [vmem:[%s3357_s4 + $0x1c8] sm:$0xff] }
 0x204   :  { %v737_v4 = vmul.f32 %v2329_v3, %v729_v8  ;;  %v736_v51 = vmul.f32 %v2329_v3, %v728_v36  ;;  %1428 = vmatpush.msra.mxu1 %v1306_v59  ;;  %1468 = vmatpush.msra.mxu3 %v1338_v56  ;;  %v2440_v49 = vld [vmem:[%s3354_s1 + $0x10] sm:$0xff] }
 0x205   :  { %v738_v54 = vmul.f32 %v2329_v3, %v730_v60  ;;  %v1730_v36 = vrot.slane %v2440_v49, 10  ;;  %v1334_v8 = vld [vmem:[%s3357_s4 + $0x1d0] sm:$0xff] }
 0x206   :  { %v750_v2 = vrot.slane %v737_v4, 6  ;;  %1429 = vmatpush.msra.mxu1 %v1305_v19  ;;  %1469 = vmatpush.msra.mxu3 %v1337_v44  ;;  %v1314_v59 = vld [vmem:[%s3357_s4 + $0x130] sm:$0xff]  ;;  %v1281_v19 = vld [vmem:[%s3357_s4 + $0x28] sm:$0xff] }
 0x207   :  { %v751_v50 = vrot.slane %v738_v54, 4 }
 0x208   :  { %v755_v41 = vsel %vm130_vm2, %v736_v51, %v750_v2  ;;  %v716_v16 = vpop.permute.xlu1 %715  ;;  %1430 = vmatpush.msra.mxu1 %v1304_v47  ;;  %1470 = vmatpush.msra.mxu3 %v1336_v9  ;;  %v2474_v51 = vmul.f32 %v2440_v49, %v1730_v36  ;;  %v1332_v2 = vld [vmem:[%s3357_s4 + $0x1c0] sm:$0xff]  ;;  %v1313_v47 = vld [vmem:[%s3357_s4 + $0x128] sm:$0xff]  ;;  %v1295_v36 = vld [vmem:[%s3357_s4 + $0x98] sm:$0xff] }
 0x209   :  { %v723_v5 = vsel %vm173_vm1, %v714_v32, %v716_v16  ;;  %v2351_v38 = vpop.permute.xlu0 %782  ;;  %v1317_v32 = vld [vmem:[%s3357_s4 + $0x148] sm:$0xff] }
 0x20a   :  { %v731_v63 = vmul.f32 %v723_v5, %v1950_v62  ;;  %v1288_v62 = vld [vmem:[%s3357_s4 + $0x60] sm:$0xff]  ;;  %v2383_v45 = vpop.permute.xlu2 %792  ;;  %1431 = vmatpush.msra.mxu1 %v1303_v55  ;;  %1471 = vmatpush.msra.mxu3 %v1335_v27  ;;  %v812_v44 = vperm.slane %v2474_v51, 0 }
 0x20b   :  { %1410 = vmatpush.msra.mxu0 %v1288_v62  ;;  %1453 = vmatpush.msra.mxu2 %v1317_v32  ;;  %v1296_v27 = vld [vmem:[%s3357_s4 + $0xa0] sm:$0xff]  ;;  %v1278_v32 = vld [vmem:[%s3357_s4 + $0x10] sm:$0xff] }
 0x20c   :  { %v739_v43 = vmul.f32 %v2329_v3, %v731_v63  ;;  %1432 = vmatpush.msra.mxu1 %v1302_v52  ;;  %1472 = vmatpush.msra.mxu3 %v1334_v8  ;;  %v1310_v8 = vld [vmem:[%s3357_s4 + $0x110] sm:$0xff] }
 0x20d   :  { %1411 = vmatpush.msra.mxu0 %v1287_v28  ;;  %1454 = vmatpush.msra.mxu2 %v1316_v14  ;;  %v813_v28 = vperm.slane %v2474_v51, 4 }
 0x20e   :  { %v752_v58 = vrot.slane %v739_v43, 2  ;;  %1433 = vmatpush.msra.mxu1 %v1301_v10  ;;  %1473 = vmatpush.msra.mxu3 %v1333_v57  ;;  %v1298_v43 = vld [vmem:[%s3357_s4 + $0xb0] sm:$0xff]  ;;  %v1327_v57 = vld [vmem:[%s3357_s4 + $0x198] sm:$0xff] }
 0x20f   :  { %1412 = vmatpush.msra.mxu0 %v1286_v11  ;;  %1455 = vmatpush.msra.mxu2 %v1315_v13 }
 0x210   :  { %v756_v40 = vsel %vm132_vm3, %v751_v50, %v752_v58  ;;  %v718_v12 = vpop.permute.xlu1 %717  ;;  %1434 = vmatpush.msra.mxu1 %v1300_v22  ;;  %1474 = vmatpush.msra.mxu3 %v1332_v2  ;;  %v1297_v50 = vld [vmem:[%s3357_s4 + $0xa8] sm:$0xff]  ;;  %v2529_v58 = vld [vmem:[%s3354_s1] sm:$0xff]  ;;  %v2592_v22 = vstv %s2509_s0 }
 0x211   :  { %v757_v39 = vsel %vm134_vm4, %v755_v41, %v756_v40  ;;  %v721_v61 = vsel %vm173_vm1, %v718_v12, %v2288_v24  ;;  %v722_v31 = vsel %vm173_vm1, %v716_v16, %v718_v12  ;;  %v2424_v6 = vpop.permute.xlu0 %788  ;;  %1413 = vmatpush.msra.mxu0 %v1285_v37  ;;  %v1282_v41 = vld [vmem:[%s3357_s4 + $0x30] sm:$0xff]  ;;  %1456 = vmatpush.msra.mxu2 %v1314_v59  ;;  %v1728_v11 = vrot.slane %v2529_v58, 10  ;;  %v1279_v12 = vld [vmem:[%s3357_s4 + $0x18] sm:$0xff]  ;;  %v1293_v59 = vld [vmem:[%s3357_s4 + $0x88] sm:$0xff] }
 0x212   :  { %v2433_v7 = vadd.f32 %v757_v39, %v2299_v18  ;;  %v732_v24 = vmul.f32 %v722_v31, %v1978_v30  ;;  %v733_v46 = vmul.f32 %v721_v61, %v1971_v21  ;;  %v1284_v18 = vld [vmem:[%s3357_s4 + $0x40] sm:$0xff]  ;;  %v742_v30 = vmul.f32 %v2329_v3, %v734_v48  ;;  %v2482_v5 = vpop.permute.xlu2 %885  ;;  %1475 = vmatpush.msra.mxu3 %v1331_v17  ;;  %v1311_v61 = vld [vmem:[%s3357_s4 + $0x118] sm:$0xff] }
 0x213   :  { %v2451_v21 = vmul.f32 %v2405_v33, %v1731_v35  ;;  %1414 = vmatpush.msra.mxu0 %v1284_v18  ;;  %v1312_v48 = vld [vmem:[%s3357_s4 + $0x120] sm:$0xff]  ;;  %v1329_v35 = vld [vmem:[%s3357_s4 + $0x1a8] sm:$0xff]  ;;  %v1729_v40 = vrot.slane %v2545_v29, 10  ;;  %1457 = vmatpush.msra.mxu2 %v1313_v47  ;;  %v826_v37 = vperm.slane %v812_v44, 0  ;;  %v827_v39 = vperm.slane %v813_v28, 0  ;;  %v1387_v47 = vld [vmem:[%s3357_s4 + $0x378] sm:$0xff] }
 0x214   :  { %v741_v53 = vmul.f32 %v2329_v3, %v733_v46  ;;  %v740_v4 = vmul.f32 %v2329_v3, %v732_v24  ;;  %v754_v16 = vrot.slane %v742_v30, 4  ;;  %v1299_v3 = vld [vmem:[%s3357_s4 + $0xb8] sm:$0xff]  ;;  %1476 = vmatpush.msra.mxu3 %v1330_v42  ;;  %v1328_v31 = vld [vmem:[%s3357_s4 + $0x1a0] sm:$0xff]  ;;  %v2564_v24 = vmul.f32 %v2529_v58, %v1728_v11  ;;  %v1354_v11 = vld [vmem:[%s3357_s4 + $0x270] sm:$0xff] }
 0x215   :  { %v814_v54 = vperm.slane %v2451_v21, 0  ;;  %1415 = vmatpush.msra.mxu0 %v1283_v34  ;;  %1435 = vmatpush.msra.mxu1 %v1299_v3  ;;  %v2573_v18 = vmul.f32 %v2545_v29, %v1729_v40  ;;  %v1277_v34 = vld [vmem:[%s3357_s4 + $0x8] sm:$0xff]  ;;  %v1308_v17 = vld [vmem:[%s3357_s4 + $0x100] sm:$0xff] }
 0x216   :  { %v753_v60 = vrot.slane %v741_v53, 6  ;;  %1458 = vmatpush.msra.mxu2 %v1312_v48  ;;  %1477 = vmatpush.msra.mxu3 %v1329_v35  ;;  %v809_v3 = vperm.slane %v2564_v24, 4  ;;  %v1292_v42 = vld [vmem:[%s3357_s4 + $0x80] sm:$0xff] }
 0x217   :  { %1416 = vmatpush.msra.mxu0 %v1282_v41  ;;  %v828_v9 = vperm.slane %v814_v54, 0  ;;  %1436 = vmatpush.msra.mxu1 %v1298_v43  ;;  %v810_v2 = vperm.slane %v2573_v18, 0  ;;  %v1276_v54 = vld [vmem:[%s3357_s4] sm:$0xff]  ;;  %v1355_v43 = vld [vmem:[%s3357_s4 + $0x278] sm:$0xff] }
 0x218   :  { %v758_v63 = vsel %vm130_vm2, %v740_v4, %v753_v60  ;;  %v2489_v20 = vpop.permute.xlu1 %784  ;;  %1459 = vmatpush.msra.mxu2 %v1311_v61  ;;  %1478 = vmatpush.msra.mxu3 %v1328_v31  ;;  %v1294_v4 = vld [vmem:[%s3357_s4 + $0x90] sm:$0xff]  ;;  %v1309_v60 = vld [vmem:[%s3357_s4 + $0x108] sm:$0xff]  ;;  %v1733_v31 = vrot.slane %v2545_v29, 11 }
 0x219   :  { %v759_v56 = vsel %vm134_vm4, %v758_v63, %v754_v16  ;;  %v2498_v62 = vpop.permute.xlu0 %794  ;;  %1417 = vmatpush.msra.mxu0 %v1281_v19  ;;  %1437 = vmatpush.msra.mxu1 %v1297_v50  ;;  %v1326_v16 = vld [vmem:[%s3357_s4 + $0x190] sm:$0xff]  ;;  %v1325_v19 = vld [vmem:[%s3357_s4 + $0x188] sm:$0xff]  ;;  %v1324_v50 = vld [vmem:[%s3357_s4 + $0x180] sm:$0xff]  ;;  %v801_v48 = vsel %vm796_vm7, %v2489_v20, %v2334_v23 }
 0x21a   :  { %v2507_v25 = vadd.f32 %v759_v56, %v2327_v15  ;;  %v1280_v15 = vld [vmem:[%s3357_s4 + $0x20] sm:$0xff]  ;;  %v797_v55 = vsel %vm796_vm7, %v2383_v45, %v2498_v62  ;;  %v2575_v30 = vpop.permute.xlu2 %986  ;;  %1460 = vmatpush.msra.mxu2 %v1310_v8  ;;  %1479 = vmatpush.msra.mxu3 %v1327_v57  ;;  %v811_v56 = vperm.slane %v2573_v18, 4  ;;  %v1732_v8 = vrot.slane %v2529_v58, 11 }
 0x21b   :  { %1418 = vmatpush.msra.mxu0 %v1280_v15  ;;  %v835_v52 = vmul.f32 %v828_v9, %v797_v55  ;;  %1438 = vmatpush.msra.mxu1 %v1296_v27  ;;  %v824_v9 = vperm.slane %v810_v2, 0  ;;  %v823_v55 = vperm.slane %v809_v3, 0  ;;  %v1386_v27 = vld [vmem:[%s3357_s4 + $0x370] sm:$0xff]  ;;  %v2693_v2 = vmul.f32 %v2545_v29, %v1733_v31  ;;  %v1381_v31 = vld [vmem:[%s3357_s4 + $0x348] sm:$0xff] }
 0x21c   :  { %1461 = vmatpush.msra.mxu2 %v1309_v60  ;;  %1480 = vmatpush.msra.mxu3 %v1326_v16  ;;  %v1351_v16 = vld [vmem:[%s3357_s4 + $0x258] sm:$0xff]  ;;  %v2702_v3 = vmul.f32 %v2529_v58, %v1732_v8 }
 0x21d   :  { %1419 = vmatpush.msra.mxu0 %v1279_v12  ;;  %v843_v41 = vmul.f32 %v2592_v22, %v835_v52  ;;  %1439 = vmatpush.msra.mxu1 %v1295_v36  ;;  %v1371_v12 = vld [vmem:[%s3357_s4 + $0x2f8] sm:$0xff]  ;;  %v808_v36 = vperm.slane %v2564_v24, 0 }
 0x21e   :  { %1462 = vmatpush.msra.mxu2 %v1308_v17  ;;  %1481 = vmatpush.msra.mxu3 %v1325_v19  ;;  %v1383_v17 = vld [vmem:[%s3357_s4 + $0x358] sm:$0xff]  ;;  %v803_v19 = vsel %vm796_vm7, %v2498_v62, %v2351_v38  ;;  %v1382_v62 = vld [vmem:[%s3357_s4 + $0x350] sm:$0xff] }
 0x21f   :  { %1420 = vmatpush.msra.mxu0 %v1278_v32  ;;  %1440 = vmatpush.msra.mxu1 %v1294_v4  ;;  %v855_v15 = vrot.slane %v843_v41, 4  ;;  %v1179_v32 = vld [vmem:[%s3356_s3 + $0x78] sm:$0xff]  ;;  %v1384_v4 = vld [vmem:[%s3357_s4 + $0x360] sm:$0xff]  ;;  %v1177_v41 = vld [vmem:[%s3356_s3 + $0x68] sm:$0xff] }
 0x220   :  { %v791_v46 = vpop.permute.xlu1 %790  ;;  %1527 = vmatpush.msrb.mxu2 %v1387_v47  ;;  %1482 = vmatpush.msra.mxu3 %v1324_v50 }
 0x221   :  { %v798_v10 = vsel %vm796_vm7, %v791_v46, %v2383_v45  ;;  %v799_v14 = vsel %vm796_vm7, %v2424_v6, %v791_v46  ;;  %v2583_v53 = vpop.permute.xlu0 %887  ;;  %1421 = vmatpush.msra.mxu0 %v1277_v34  ;;  %1441 = vmatpush.msra.mxu1 %v1293_v59  ;;  %v800_v46 = vsel %vm796_vm7, %v2334_v23, %v2424_v6  ;;  %v1385_v23 = vld [vmem:[%s3357_s4 + $0x368] sm:$0xff]  ;;  %v1352_v34 = vld [vmem:[%s3357_s4 + $0x260] sm:$0xff] }
 0x222   :  { %v833_v13 = vmul.f32 %v826_v37, %v799_v14  ;;  %v834_v45 = vmul.f32 %v827_v39, %v798_v10  ;;  %v825_v37 = vperm.slane %v811_v56, 0  ;;  %v802_v39 = vsel %vm796_vm7, %v2351_v38, %v2489_v20  ;;  %v1353_v10 = vld [vmem:[%s3357_s4 + $0x268] sm:$0xff]  ;;  %v1370_v14 = vld [vmem:[%s3357_s4 + $0x2f0] sm:$0xff]  ;;  %v2678_v57 = vpop.permute.xlu2 %992  ;;  %1528 = vmatpush.msrb.mxu2 %v1386_v27  ;;  %1564 = vmatpush.msrb.mxu3 %v1179_v32  ;;  %v1368_v59 = vld [vmem:[%s3357_s4 + $0x2e0] sm:$0xff] }
 0x223   :  { %1422 = vmatpush.msra.mxu0 %v1276_v54  ;;  %1442 = vmatpush.msra.mxu1 %v1292_v42  ;;  %v831_v6 = vmul.f32 %v824_v9, %v801_v48  ;;  %v822_v54 = vperm.slane %v808_v36, 0  ;;  %v1367_v38 = vld [vmem:[%s3357_s4 + $0x2d8] sm:$0xff]  ;;  %v911_v9 = vperm.slane %v2693_v2, 0  ;;  %v910_v48 = vperm.slane %v2702_v3, 4 }
 0x224   :  { %v842_v63 = vmul.f32 %v2592_v22, %v834_v45  ;;  %v841_v44 = vmul.f32 %v2592_v22, %v833_v13  ;;  %v830_v13 = vmul.f32 %v823_v55, %v802_v39  ;;  %v1369_v45 = vld [vmem:[%s3357_s4 + $0x2e8] sm:$0xff]  ;;  %v832_v60 = vmul.f32 %v825_v37, %v800_v46  ;;  %1529 = vmatpush.msrb.mxu2 %v1385_v23  ;;  %v1348_v23 = vld [vmem:[%s3357_s4 + $0x240] sm:$0xff] }
 0x225   :  { %1487 = vmatpush.msrb.mxu0 %v1355_v43  ;;  %1507 = vmatpush.msrb.mxu1 %v1371_v12  ;;  %v839_v56 = vmul.f32 %v2592_v22, %v831_v6  ;;  %v1176_v43 = vld [vmem:[%s3356_s3 + $0x60] sm:$0xff]  ;;  %v829_v55 = vmul.f32 %v822_v54, %v803_v19  ;;  %v1737_v12 = vrot.slane %v2545_v29, 9  ;;  %v912_v37 = vperm.slane %v2693_v2, 4  ;;  %v1365_v6 = vld [vmem:[%s3357_s4 + $0x2c8] sm:$0xff] }
 0x226   :  { %v854_v28 = vrot.slane %v842_v63, 6  ;;  %v1736_v63 = vrot.slane %v2529_v58, 9  ;;  %1530 = vmatpush.msrb.mxu2 %v1384_v4  ;;  %v840_v42 = vmul.f32 %v2592_v22, %v832_v60  ;;  %v925_v46 = vperm.slane %v911_v9, 0  ;;  %v1380_v4 = vld [vmem:[%s3357_s4 + $0x340] sm:$0xff]  ;;  %v1173_v60 = vld [vmem:[%s3356_s3 + $0x48] sm:$0xff]  ;;  %v1171_v9 = vld [vmem:[%s3356_s3 + $0x38] sm:$0xff] }
 0x227   :  { %1488 = vmatpush.msrb.mxu0 %v1354_v11  ;;  %1508 = vmatpush.msrb.mxu1 %v1370_v14  ;;  %v1175_v11 = vld [vmem:[%s3356_s3 + $0x58] sm:$0xff]  ;;  %v852_v27 = vrot.slane %v839_v56, 4  ;;  %v1174_v14 = vld [vmem:[%s3356_s3 + $0x50] sm:$0xff]  ;;  %v1364_v54 = vld [vmem:[%s3357_s4 + $0x2c0] sm:$0xff] }
 0x228   :  { %v859_v35 = vsel %vm130_vm2, %v841_v44, %v854_v28  ;;  %v2641_v40 = vpop.permute.xlu1 %883  ;;  %v1350_v44 = vld [vmem:[%s3357_s4 + $0x250] sm:$0xff]  ;;  %v838_v28 = vmul.f32 %v2592_v22, %v830_v13  ;;  %1531 = vmatpush.msrb.mxu2 %v1383_v17  ;;  %v853_v32 = vrot.slane %v840_v42, 2 }
 0x229   :  { %v860_v61 = vsel %vm134_vm4, %v859_v35, %v855_v15  ;;  %v2655_v52 = vpop.permute.xlu0 %891  ;;  %1489 = vmatpush.msrb.mxu0 %v1353_v10  ;;  %1509 = vmatpush.msrb.mxu1 %v1369_v45  ;;  %v1734_v15 = vrot.slane %v2440_v49, 11  ;;  %v2743_v35 = vmul.f32 %v2529_v58, %v1736_v63  ;;  %v1349_v58 = vld [vmem:[%s3357_s4 + $0x248] sm:$0xff]  ;;  %v909_v10 = vperm.slane %v2702_v3, 0  ;;  %v1379_v3 = vld [vmem:[%s3357_s4 + $0x338] sm:$0xff]  ;;  %v1172_v63 = vld [vmem:[%s3356_s3 + $0x40] sm:$0xff] }
 0x22a   :  { %v2666_v20 = vadd.f32 %v860_v61, %v2507_v25  ;;  %v1178_v25 = vld [vmem:[%s3356_s3 + $0x70] sm:$0xff]  ;;  %1532 = vmatpush.msrb.mxu2 %v1382_v62  ;;  %v851_v39 = vrot.slane %v838_v28, 6  ;;  %v2759_v36 = vpop.permute.xlu2 %984  ;;  %v2777_v45 = vmul.f32 %v2545_v29, %v1737_v12  ;;  %v857_v2 = vsel %vm132_vm3, %v852_v27, %v853_v32  ;;  %v1363_v28 = vld [vmem:[%s3357_s4 + $0x2b8] sm:$0xff] }
 0x22b   :  { %1565 = vmatpush.msrb.mxu3 %v1178_v25  ;;  %1490 = vmatpush.msrb.mxu0 %v1352_v34  ;;  %v1366_v61 = vld [vmem:[%s3357_s4 + $0x2d0] sm:$0xff]  ;;  %v2762_v8 = vmul.f32 %v2440_v49, %v1734_v15  ;;  %v837_v25 = vmul.f32 %v2592_v22, %v829_v55  ;;  %v924_v34 = vperm.slane %v910_v48, 0  ;;  %v1010_v13 = vperm.slane %v2743_v35, 1  ;;  %v1347_v22 = vld [vmem:[%s3357_s4 + $0x238] sm:$0xff] }
 0x22c   :  { %1510 = vmatpush.msrb.mxu1 %v1368_v59  ;;  %1533 = vmatpush.msrb.mxu2 %v1381_v31  ;;  %v902_v29 = vsel %vm897_vm8, %v2482_v5, %v2583_v53  ;;  %v903_v17 = vsel %vm897_vm8, %v2641_v40, %v2482_v5  ;;  %v2822_v5 = vstv %s2732_s18  ;;  %v1378_v42 = vld [vmem:[%s3357_s4 + $0x330] sm:$0xff]  ;;  %v1012_v55 = vperm.slane %v2777_v45, 1  ;;  %s2851_s18 = sld [smem:[#allocation2 + $0x102]]  ;;  %v1345_v31 = vld [vmem:[%s3357_s4 + $0x228] sm:$0xff] }
 0x22d   :  { %1566 = vmatpush.msrb.mxu3 %v1177_v41  ;;  %1491 = vmatpush.msrb.mxu0 %v1351_v16  ;;  %v926_v41 = vperm.slane %v912_v37, 0  ;;  %v1011_v16 = vperm.slane %v2743_v35, 5  ;;  %v856_v59 = vsel %vm130_vm2, %v837_v25, %v851_v39  ;;  %v932_v15 = vmul.f32 %v925_v46, %v902_v29  ;;  %v1362_v32 = vld [vmem:[%s3357_s4 + $0x2b0] sm:$0xff]  ;;  %v1377_v46 = vld [vmem:[%s3357_s4 + $0x328] sm:$0xff]  ;;  %v1344_v25 = vld [vmem:[%s3357_s4 + $0x220] sm:$0xff] }
 0x22e   :  { %1511 = vmatpush.msrb.mxu1 %v1367_v38  ;;  %1534 = vmatpush.msrb.mxu2 %v1380_v4  ;;  %v923_v38 = vperm.slane %v909_v10, 0  ;;  %v1013_v48 = vperm.slane %v2777_v45, 5  ;;  %v858_v35 = vsel %vm134_vm4, %v856_v59, %v857_v2  ;;  %v931_v12 = vmul.f32 %v924_v34, %v903_v17  ;;  %v1361_v34 = vld [vmem:[%s3357_s4 + $0x2a8] sm:$0xff] }
 0x22f   :  { %1567 = vmatpush.msrb.mxu3 %v1176_v43  ;;  %1492 = vmatpush.msrb.mxu0 %v1350_v44  ;;  %v1738_v43 = vrot.slane %v2440_v49, 9  ;;  %v1346_v44 = vld [vmem:[%s3357_s4 + $0x230] sm:$0xff]  ;;  %v1025_v37 = vperm.slane %v1011_v16, 1  ;;  %v1024_v39 = vperm.slane %v1010_v13, 1  ;;  %v2882_v13 = vmul.f32 %v2822_v5, %v932_v15 }
 0x230   :  { %v2723_v47 = vpop.permute.xlu1 %889  ;;  %1512 = vmatpush.msrb.mxu1 %v1366_v61  ;;  %1535 = vmatpush.msrb.mxu2 %v1379_v3  ;;  %v1026_v45 = vperm.slane %v1012_v55, 1  ;;  %v1027_v4 = vperm.slane %v1013_v48, 1  ;;  %v939_v2 = vmul.f32 %v2822_v5, %v931_v12  ;;  %v1375_v3 = vld [vmem:[%s3357_s4 + $0x318] sm:$0xff]  ;;  %v1374_v55 = vld [vmem:[%s3357_s4 + $0x310] sm:$0xff] }
 0x231   :  { %v2736_v50 = vpop.permute.xlu0 %988  ;;  %1568 = vmatpush.msrb.mxu3 %v1175_v11  ;;  %1493 = vmatpush.msrb.mxu0 %v1349_v58  ;;  %v901_v56 = vsel %vm897_vm8, %v2583_v53, %v2723_v47  ;;  %v913_v53 = vperm.slane %v2762_v8, 0  ;;  %v2842_v58 = vstv %s2746_s21  ;;  %v2849_v61 = vmul.f32 %v2440_v49, %v1738_v43  ;;  %v1167_v48 = vld [vmem:[%s3356_s3 + $0x18] sm:$0xff] }
 0x232   :  { %1513 = vmatpush.msrb.mxu1 %v1365_v6  ;;  %v933_v27 = vmul.f32 %v926_v41, %v901_v56  ;;  %1536 = vmatpush.msrb.mxu2 %v1378_v42  ;;  %v1004_v49 = vsel %vm998_vm9, %v2759_v36, %v2575_v30  ;;  %v1170_v6 = vld [vmem:[%s3356_s3 + $0x30] sm:$0xff]  ;;  %v2897_v16 = vpop.permute.xlu2 %1091  ;;  %v1108_v43 = vperm.slane %v2564_v24, 5 }
 0x233   :  { %1569 = vmatpush.msrb.mxu3 %v1174_v14  ;;  %1494 = vmatpush.msrb.mxu0 %v1348_v23  ;;  %v2866_v10 = vperm.slane %v913_v53, 0  ;;  %v1110_v23 = vperm.slane %v2573_v18, 5  ;;  %v1031_v59 = vmul.f32 %v1024_v39, %v1004_v49  ;;  %v1014_v17 = vperm.slane %v2849_v61, 1  ;;  %v1359_v53 = vld [vmem:[%s3357_s4 + $0x298] sm:$0xff] }
 0x234   :  { %1514 = vmatpush.msrb.mxu1 %v1364_v54  ;;  %1537 = vmatpush.msrb.mxu2 %v1377_v46  ;;  %v2895_v29 = vmul.f32 %v2822_v5, %v933_v27  ;;  %v1360_v54 = vld [vmem:[%s3357_s4 + $0x2a0] sm:$0xff]  ;;  %v1109_v27 = vperm.slane %v2573_v18, 1  ;;  %v1739_v18 = vrot.slane %v2405_v33, 9 }
 0x235   :  { %1570 = vmatpush.msrb.mxu3 %v1173_v60  ;;  %1495 = vmatpush.msrb.mxu0 %v1347_v22  ;;  %v1376_v60 = vld [vmem:[%s3357_s4 + $0x320] sm:$0xff]  ;;  %v1169_v22 = vld [vmem:[%s3356_s3 + $0x28] sm:$0xff]  ;;  %v1124_v15 = vperm.slane %v1110_v23, 1 }
 0x236   :  { %1515 = vmatpush.msrb.mxu1 %v1363_v28  ;;  %1538 = vmatpush.msrb.mxu2 %v1376_v60  ;;  %v1342_v28 = vld [vmem:[%s3357_s4 + $0x210] sm:$0xff]  ;;  %v954_v39 = vrot.slane %v2895_v29, 2  ;;  %v1373_v23 = vld [vmem:[%s3357_s4 + $0x308] sm:$0xff]  ;;  %v1340_v60 = vld [vmem:[%s3357_s4 + $0x200] sm:$0xff]  ;;  %v1123_v29 = vperm.slane %v1109_v27, 1 }
 0x237   :  { %1571 = vmatpush.msrb.mxu3 %v1172_v63  ;;  %1496 = vmatpush.msrb.mxu0 %v1346_v44  ;;  %v1168_v63 = vld [vmem:[%s3356_s3 + $0x20] sm:$0xff]  ;;  %v1735_v44 = vrot.slane %v2405_v33, 11 }
 0x238   :  { %v2812_v19 = vpop.permute.xlu1 %895  ;;  %1516 = vmatpush.msrb.mxu1 %v1362_v32  ;;  %1539 = vmatpush.msrb.mxu2 %v1375_v3  ;;  %v1039_v3 = vmul.f32 %v2842_v58, %v1031_v59 }
 0x239   :  { %v2826_v62 = vpop.permute.xlu0 %1087  ;;  %v904_v11 = vsel %vm897_vm8, %v2812_v19, %v2641_v40  ;;  %v1003_v40 = vsel %vm998_vm9, %v2575_v30, %v2736_v50  ;;  %1572 = vmatpush.msrb.mxu3 %v1171_v9  ;;  %1497 = vmatpush.msrb.mxu0 %v1345_v31  ;;  %v2879_v30 = vadd.f32 %v858_v35, %v2433_v7  ;;  %v1343_v7 = vld [vmem:[%s3357_s4 + $0x218] sm:$0xff]  ;;  %v1107_v31 = vperm.slane %v2564_v24, 1  ;;  %v1358_v24 = vld [vmem:[%s3357_s4 + $0x290] sm:$0xff] }
 0x23a   :  { %v930_v14 = vmul.f32 %v923_v38, %v904_v11  ;;  %v1032_v41 = vmul.f32 %v1025_v37, %v1003_v40  ;;  %1517 = vmatpush.msrb.mxu1 %v1361_v34  ;;  %v952_v37 = vrot.slane %v939_v2, 6  ;;  %v441_v49 = vmul.f32 %v2405_v33, %v1735_v44  ;;  %1540 = vmatpush.msrb.mxu2 %v1374_v55  ;;  %v1356_v44 = vld [vmem:[%s3357_s4 + $0x280] sm:$0xff] }
 0x23b   :  { %1573 = vmatpush.msrb.mxu3 %v1170_v6  ;;  %1498 = vmatpush.msrb.mxu0 %v1344_v25  ;;  %v953_v6 = vrot.slane %v2882_v13, 4  ;;  %v2958_v25 = vstv %s2851_s18 }
 0x23c   :  { %v938_v38 = vmul.f32 %v2822_v5, %v930_v14  ;;  %1518 = vmatpush.msrb.mxu1 %v1360_v54  ;;  %v2940_v40 = vmul.f32 %v2842_v58, %v1032_v41  ;;  %v1341_v14 = vld [vmem:[%s3357_s4 + $0x208] sm:$0xff]  ;;  %1541 = vmatpush.msrb.mxu2 %v1373_v23  ;;  %v1372_v41 = vld [vmem:[%s3357_s4 + $0x300] sm:$0xff] }
 0x23d   :  { %1574 = vmatpush.msrb.mxu3 %v1169_v22  ;;  %1499 = vmatpush.msrb.mxu0 %v1343_v7  ;;  %v1357_v22 = vld [vmem:[%s3357_s4 + $0x288] sm:$0xff] }
 0x23e   :  { %1519 = vmatpush.msrb.mxu1 %v1359_v53  ;;  %v957_v13 = vsel %vm130_vm2, %v938_v38, %v952_v37  ;;  %v1165_v54 = vld [vmem:[%s3356_s3 + $0x8] sm:$0xff]  ;;  %v958_v53 = vsel %vm132_vm3, %v953_v6, %v954_v39  ;;  %v1053_v38 = vrot.slane %v2940_v40, 6  ;;  %1542 = vmatpush.msrb.mxu2 %v1372_v41  ;;  %v1113_v37 = vperm.slane %v2451_v21, 1 }
 0x23f   :  { %1575 = vmatpush.msrb.mxu3 %v1168_v63  ;;  %1500 = vmatpush.msrb.mxu0 %v1342_v28  ;;  %v2977_v63 = vperm.slane %v1014_v17, 1  ;;  %v1164_v28 = vld [vmem:[%s3356_s3] sm:$0xff]  ;;  %v915_v17 = vperm.slane %v441_v49, 0  ;;  %v1015_v40 = vperm.slane %v2849_v61, 5  ;;  %v1112_v41 = vperm.slane %v2474_v51, 5 }
 0x240   :  { %v991_v56 = vpop.permute.xlu1 %990  ;;  %1520 = vmatpush.msrb.mxu1 %v1358_v24 }
 0x241   :  { %v1001_v42 = vsel %vm998_vm9, %v991_v56, %v2678_v57  ;;  %v1002_v9 = vsel %vm998_vm9, %v2736_v50, %v991_v56  ;;  %v2925_v11 = vpop.permute.xlu0 %1093  ;;  %1576 = vmatpush.msrb.mxu3 %v1167_v48  ;;  %1501 = vmatpush.msrb.mxu0 %v1341_v14  ;;  %v1121_v56 = vperm.slane %v1107_v31, 1  ;;  %v1058_v31 = vsel %vm130_vm2, %v1039_v3, %v1053_v38 }
 0x242   :  { %v1033_v35 = vmul.f32 %v1026_v45, %v1002_v9  ;;  %v1034_v12 = vmul.f32 %v1027_v4, %v1001_v42  ;;  %v1102_v50 = vsel %vm1099_vm10, %v2897_v16, %v2925_v11  ;;  %v1122_v45 = vperm.slane %v1108_v43, 1  ;;  %v1166_v4 = vld [vmem:[%s3356_s3 + $0x10] sm:$0xff]  ;;  %1521 = vmatpush.msrb.mxu1 %v1357_v22  ;;  %v995_v9 = vpop.permute.xlu2 %994 }
 0x243   :  { %v1131_v34 = vmul.f32 %v1124_v15, %v1102_v50  ;;  %1577 = vmatpush.msrb.mxu3 %v1166_v4  ;;  %v914_v43 = vperm.slane %v2762_v8, 4  ;;  %1502 = vmatpush.msrb.mxu0 %v1340_v60  ;;  %v457_v42 = vmul.f32 %v2405_v33, %v1739_v18  ;;  %v959_v8 = vsel %vm134_vm4, %v957_v13, %v958_v53 }
 0x244   :  { %v1041_v32 = vmul.f32 %v2842_v58, %v1033_v35  ;;  %v1042_v46 = vmul.f32 %v2842_v58, %v1034_v12  ;;  %1522 = vmatpush.msrb.mxu1 %v1356_v44  ;;  %v929_v24 = vperm.slane %v915_v17, 0  ;;  %v1111_v4 = vperm.slane %v2474_v51, 1 }
 0x245   :  { %1578 = vmatpush.msrb.mxu3 %v1165_v54  ;;  %v1139_v15 = vmul.f32 %v2958_v25, %v1131_v34  ;;  %v1016_v49 = vperm.slane %v457_v42, 1  ;;  %v928_v14 = vperm.slane %v914_v43, 0  ;;  %v1000_v34 = vsel %vm998_vm9, %v2678_v57, %v995_v9 }
 0x246   :  { %v1054_v7 = vrot.slane %v1041_v32, 4  ;;  %v1055_v2 = vrot.slane %v1042_v46, 2  ;;  %v1035_v42 = vmul.f32 %v2977_v63, %v1000_v34 }
 0x247   :  { %1579 = vmatpush.msrb.mxu3 %v1164_v28  ;;  %v1152_v23 = vrot.slane %v1139_v15, 2  ;;  %v1127_v28 = vperm.slane %v1113_v37, 1 }
 0x248   :  { %v1090_v59 = vpop.permute.xlu1 %1089  ;;  %v1059_v12 = vsel %vm132_vm3, %v1054_v7, %v1055_v2  ;;  %v1030_v7 = vperm.slane %v1016_v49, 1  ;;  %v1043_v37 = vmul.f32 %v2842_v58, %v1035_v42  ;;  %v1220_v42 = vld [vmem:[%s3356_s3 + $0x1c0] sm:$0xff] }
 0x249   :  { %v1103_v55 = vsel %vm1099_vm10, %v1090_v59, %v2897_v16  ;;  %v1104_v48 = vsel %vm1099_vm10, %v2826_v62, %v1090_v59  ;;  %v1086_v35 = vpop.permute.xlu0 %1085  ;;  %v900_v16 = vsel %vm897_vm8, %v2723_v47, %v2655_v52  ;;  %v1060_v18 = vsel %vm134_vm4, %v1058_v31, %v1059_v12 }
 0x24a   :  { %v1129_v33 = vmul.f32 %v1122_v45, %v1104_v48  ;;  %v1130_v50 = vmul.f32 %v1123_v29, %v1103_v55  ;;  %v1105_v27 = vsel %vm1099_vm10, %v1086_v35, %v2826_v62  ;;  %v964_v62 = vadd.f32 %v959_v8, %v2879_v30  ;;  %v1098_v44 = vpop.permute.xlu2 %1097 }
 0x24b   :  { %v1128_v39 = vmul.f32 %v1121_v56, %v1105_v27  ;;  %v934_v61 = vmul.f32 %v2866_v10, %v900_v16  ;;  %v1029_v45 = vperm.slane %v1015_v40, 1  ;;  %v1106_v38 = vsel %vm1099_vm10, %v1098_v44, %v1086_v35  ;;  %v1195_v16 = vld [vmem:[%s3356_s3 + $0xf8] sm:$0xff] }
 0x24c   :  { %v1137_v32 = vmul.f32 %v2958_v25, %v1129_v33  ;;  %v1138_v46 = vmul.f32 %v2958_v25, %v1130_v50  ;;  %v1065_v60 = vadd.f32 %v1060_v18, %v964_v62  ;;  %v1126_v48 = vperm.slane %v1112_v41, 1  ;;  %v1240_v41 = vld [vmem:[%s3356_s3 + $0x260] sm:$0xff] }
 0x24d   :  { %v1136_v21 = vmul.f32 %v2958_v25, %v1128_v39  ;;  %v942_v17 = vmul.f32 %v2822_v5, %v934_v61  ;;  %v1134_v12 = vmul.f32 %v1127_v28, %v1106_v38  ;;  %v1210_v61 = vld [vmem:[%s3356_s3 + $0x170] sm:$0xff]  ;;  %v1189_v38 = vld [vmem:[%s3356_s3 + $0xc8] sm:$0xff] }
 0x24e   :  { %v1150_v47 = vrot.slane %v1137_v32, 6  ;;  %v1151_v6 = vrot.slane %v1138_v46, 4  ;;  %v1227_v32 = vld [vmem:[%s3356_s3 + $0x1f8] sm:$0xff]  ;;  %v1222_v28 = vld [vmem:[%s3356_s3 + $0x1d0] sm:$0xff] }
 0x24f   :  { %v1211_v46 = vld [vmem:[%s3356_s3 + $0x178] sm:$0xff] }
 0x250   :  { %v1156_v30 = vsel %vm132_vm3, %v1151_v6, %v1152_v23  ;;  %v1155_v22 = vsel %vm130_vm2, %v1136_v21, %v1150_v47  ;;  %v894_v13 = vpop.permute.xlu1 %893  ;;  %v1194_v47 = vld [vmem:[%s3356_s3 + $0xf0] sm:$0xff] }
 0x251   :  { %v1157_v2 = vsel %vm134_vm4, %v1155_v22, %v1156_v30  ;;  %v898_v10 = vsel %vm897_vm8, %v894_v13, %v2812_v19  ;;  %v899_v57 = vsel %vm897_vm8, %v2655_v52, %v894_v13  ;;  %v997_v29 = vpop.permute.xlu0 %996  ;;  %v1209_v22 = vld [vmem:[%s3356_s3 + $0x168] sm:$0xff] }
 0x252   :  { %v1162_v54 = vadd.f32 %v1157_v2, %v1065_v60  ;;  %v935_v3 = vmul.f32 %v928_v14, %v899_v57  ;;  %v936_v56 = vmul.f32 %v929_v24, %v898_v10  ;;  %v999_v43 = vsel %vm998_vm9, %v995_v9, %v997_v29  ;;  %v1241_v13 = vld [vmem:[%s3356_s3 + $0x268] sm:$0xff]  ;;  %v1192_v2 = vld [vmem:[%s3356_s3 + $0xe0] sm:$0xff] }
 0x253   :  { %v1005_v53 = vsel %vm998_vm9, %v997_v29, %v2759_v36  ;;  %v1036_v19 = vmul.f32 %v1029_v45, %v999_v43  ;;  %v1125_v9 = vperm.slane %v1111_v4, 1  ;;  %v1225_v4 = vld [vmem:[%s3356_s3 + $0x1e8] sm:$0xff]  ;;  %v1224_v10 = vld [vmem:[%s3356_s3 + $0x1e0] sm:$0xff]  ;;  %v1239_v43 = vld [vmem:[%s3356_s3 + $0x258] sm:$0xff] }
 0x254   :  { %1390 = vst [vmem:[#allocation1] ss:$4 sm:$0xff] %v1162_v54  ;;  %v943_v52 = vmul.f32 %v2822_v5, %v935_v3  ;;  %v944_v51 = vmul.f32 %v2822_v5, %v936_v56  ;;  %v1037_v59 = vmul.f32 %v1030_v7, %v1005_v53  ;;  %v1208_v29 = vld [vmem:[%s3356_s3 + $0x160] sm:$0xff]  ;;  %v1191_v54 = vld [vmem:[%s3356_s3 + $0xd8] sm:$0xff]  ;;  %v1206_v53 = vld [vmem:[%s3356_s3 + $0x150] sm:$0xff] }
 0x255   :  { %v1044_v8 = vmul.f32 %v2842_v58, %v1036_v19  ;;  %v1223_v3 = vld [vmem:[%s3356_s3 + $0x1d8] sm:$0xff]  ;;  %v1238_v19 = vld [vmem:[%s3356_s3 + $0x250] sm:$0xff] }
 0x256   :  { %v955_v15 = vrot.slane %v943_v52, 6  ;;  %v956_v55 = vrot.slane %v944_v51, 4  ;;  %v1045_v36 = vmul.f32 %v2842_v58, %v1037_v59  ;;  %v1207_v56 = vld [vmem:[%s3356_s3 + $0x158] sm:$0xff]  ;;  %v1221_v52 = vld [vmem:[%s3356_s3 + $0x1c8] sm:$0xff] }
 0x257   :  { %v1056_v33 = vrot.slane %v1044_v8, 6  ;;  %v1205_v51 = vld [vmem:[%s3356_s3 + $0x148] sm:$0xff]  ;;  %v1187_v8 = vld [vmem:[%s3356_s3 + $0xb8] sm:$0xff] }
 0x258   :  { %v960_v35 = vsel %vm130_vm2, %v942_v17, %v955_v15  ;;  %v1096_v50 = vpop.permute.xlu1 %1095  ;;  %v1057_v39 = vrot.slane %v1045_v36, 4  ;;  %v1237_v59 = vld [vmem:[%s3356_s3 + $0x248] sm:$0xff]  ;;  %v1188_v17 = vld [vmem:[%s3356_s3 + $0xc0] sm:$0xff] }
 0x259   :  { %v961_v27 = vsel %vm134_vm4, %v960_v35, %v956_v55  ;;  %v1100_v5 = vsel %vm1099_vm10, %v1096_v50, %v1098_v44  ;;  %v1101_v63 = vsel %vm1099_vm10, %v2925_v11, %v1096_v50  ;;  %v1142_v11 = vmul.f32 %v2958_v25, %v1134_v12  ;;  %v1190_v44 = vld [vmem:[%s3356_s3 + $0xd0] sm:$0xff]  ;;  %v1204_v36 = vld [vmem:[%s3356_s3 + $0x140] sm:$0xff]  ;;  %v1203_v50 = vld [vmem:[%s3356_s3 + $0x138] sm:$0xff] }
 0x25a   :  { %v1132_v40 = vmul.f32 %v1125_v9, %v1101_v63  ;;  %v1133_v31 = vmul.f32 %v1126_v48, %v1100_v5  ;;  %v965_v58 = vadd.f32 %v961_v27, %v2666_v20  ;;  %v1061_v18 = vsel %vm130_vm2, %v1043_v37, %v1056_v33  ;;  %v1226_v20 = vld [vmem:[%s3356_s3 + $0x1f0] sm:$0xff]  ;;  %v1219_v48 = vld [vmem:[%s3356_s3 + $0x1b8] sm:$0xff]  ;;  %v1236_v12 = vld [vmem:[%s3356_s3 + $0x240] sm:$0xff] }
 0x25b   :  { %v1393_v49 = vld.sshfl [vmem:[#allocation1] sm:$0xff pattern:$0x73625140]  ;;  %v1394_v62 = vld.sshfl [vmem:[#allocation1 + $0x8] sm:$0xff pattern:$0x73625140]  ;;  %v1062_v45 = vsel %vm134_vm4, %v1061_v18, %v1057_v39 }
 0x25c   :  { %v1141_v14 = vmul.f32 %v2958_v25, %v1133_v31  ;;  %1423 = vmatmul.f32.vlgmr.msra.gmra.mxu0 %v1393_v49  ;;  %1443 = vmatmul.f32.vlgmr.msra.gmra.mxu1 %v1394_v62  ;;  %v1395_v24 = vld.sshfl [vmem:[#allocation1 + $0x10] sm:$0xff pattern:$0x73625140]  ;;  %v1396_v23 = vld.sshfl [vmem:[#allocation1 + $0x18] sm:$0xff pattern:$0x73625140]  ;;  %v1140_v6 = vmul.f32 %v2958_v25, %v1132_v40  ;;  %v1066_v60 = vadd.f32 %v1062_v45, %v965_v58 }
 0x25d   :  { %1463 = vmatmul.f32.vlgmr.msra.gmra.mxu2 %v1395_v24  ;;  %1483 = vmatmul.f32.vlgmr.msra.gmra.mxu3 %v1396_v23  ;;  %1547 = vst [vmem:[#allocation1] ss:$4 sm:$0xff] %v1854_v0  ;;  %v1242_v0 = vld [vmem:[%s3356_s3 + $0x270] sm:$0xff]  ;;  %v1154_v34 = vrot.slane %v1142_v11, 4  ;;  %v1193_v25 = vld [vmem:[%s3356_s3 + $0xe8] sm:$0xff]  ;;  %v1235_v27 = vld [vmem:[%s3356_s3 + $0x238] sm:$0xff] }
 0x25e   :  { %v1153_v21 = vrot.slane %v1141_v14, 6  ;;  %1584 = vmatpush.msra.mxu0 %v1195_v16  ;;  %1624 = vmatpush.msra.mxu2 %v1227_v32  ;;  %v1186_v35 = vld [vmem:[%s3356_s3 + $0xb0] sm:$0xff]  ;;  %v1185_v5 = vld [vmem:[%s3356_s3 + $0xa8] sm:$0xff]  ;;  %v1184_v39 = vld [vmem:[%s3356_s3 + $0xa0] sm:$0xff] }
 0x25f   :  { %1604 = vmatpush.msra.mxu1 %v1211_v46  ;;  %1644 = vmatpush.msra.mxu3 %v1243_v26  ;;  %v1202_v63 = vld [vmem:[%s3356_s3 + $0x130] sm:$0xff]  ;;  %v1217_v16 = vld [vmem:[%s3356_s3 + $0x1a8] sm:$0xff]  ;;  %v1216_v31 = vld [vmem:[%s3356_s3 + $0x1a0] sm:$0xff] }
 0x260   :  { %v1158_v30 = vsel %vm130_vm2, %v1140_v6, %v1153_v21  ;;  %1585 = vmatpush.msra.mxu0 %v1194_v47  ;;  %1625 = vmatpush.msra.mxu2 %v1226_v20  ;;  %v1234_v37 = vld [vmem:[%s3356_s3 + $0x230] sm:$0xff]  ;;  %v1201_v40 = vld [vmem:[%s3356_s3 + $0x128] sm:$0xff]  ;;  %v1183_v46 = vld [vmem:[%s3356_s3 + $0x98] sm:$0xff] }
 0x261   :  { %v1159_v7 = vsel %vm134_vm4, %v1158_v30, %v1154_v34  ;;  %1605 = vmatpush.msra.mxu1 %v1210_v61  ;;  %1645 = vmatpush.msra.mxu3 %v1242_v0  ;;  %v1233_v32 = vld [vmem:[%s3356_s3 + $0x228] sm:$0xff]  ;;  %v1200_v26 = vld [vmem:[%s3356_s3 + $0x120] sm:$0xff]  ;;  %v1215_v11 = vld [vmem:[%s3356_s3 + $0x198] sm:$0xff] }
 0x262   :  { %v1163_v57 = vadd.f32 %v1159_v7, %v1066_v60  ;;  %1586 = vmatpush.msra.mxu0 %v1193_v25  ;;  %1626 = vmatpush.msra.mxu2 %v1225_v4  ;;  %v1232_v49 = vld [vmem:[%s3356_s3 + $0x220] sm:$0xff]  ;;  %v1182_v62 = vld [vmem:[%s3356_s3 + $0x90] sm:$0xff]  ;;  %v1199_v58 = vld [vmem:[%s3356_s3 + $0x118] sm:$0xff] }
 0x263   :  { %1606 = vmatpush.msra.mxu1 %v1209_v22  ;;  %1646 = vmatpush.msra.mxu3 %v1241_v13  ;;  %v1214_v18 = vld [vmem:[%s3356_s3 + $0x190] sm:$0xff]  ;;  %v1231_v14 = vld [vmem:[%s3356_s3 + $0x218] sm:$0xff]  ;;  %v1181_v24 = vld [vmem:[%s3356_s3 + $0x88] sm:$0xff] }
 0x264   :  { %1392 = vst [vmem:[#allocation1 + $0x20] ss:$4 sm:$0xff] %v1163_v57  ;;  %1587 = vmatpush.msra.mxu0 %v1192_v2  ;;  %1627 = vmatpush.msra.mxu2 %v1224_v10  ;;  %v1550_v33 = vld.sshfl [vmem:[#allocation1] sm:$0xff pattern:$0x73625140]  ;;  %v1198_v23 = vld [vmem:[%s3356_s3 + $0x110] sm:$0xff] }
 0x265   :  { %1607 = vmatpush.msra.mxu1 %v1208_v29  ;;  %1647 = vmatpush.msra.mxu3 %v1240_v41  ;;  %v1213_v47 = vld [vmem:[%s3356_s3 + $0x188] sm:$0xff]  ;;  %v1230_v20 = vld [vmem:[%s3356_s3 + $0x210] sm:$0xff]  ;;  %v1180_v6 = vld [vmem:[%s3356_s3 + $0x80] sm:$0xff] }
 0x266   :  { %1588 = vmatpush.msra.mxu0 %v1191_v54  ;;  %1628 = vmatpush.msra.mxu2 %v1223_v3  ;;  %v1197_v21 = vld [vmem:[%s3356_s3 + $0x108] sm:$0xff]  ;;  %v1212_v61 = vld [vmem:[%s3356_s3 + $0x180] sm:$0xff]  ;;  %v1553_v45 = vld.sshfl [vmem:[#allocation1 + $0x18] sm:$0xff pattern:$0x73625140] }
 0x267   :  { %1608 = vmatpush.msra.mxu1 %v1207_v56  ;;  %1648 = vmatpush.msra.mxu3 %v1239_v43  ;;  %v1229_v0 = vld [vmem:[%s3356_s3 + $0x208] sm:$0xff]  ;;  %v1259_v25 = vld [vmem:[%s3356_s3 + $0x2f8] sm:$0xff]  ;;  %v1196_v4 = vld [vmem:[%s3356_s3 + $0x100] sm:$0xff] }
 0x268   :  { %1589 = vmatpush.msra.mxu0 %v1190_v44  ;;  %1629 = vmatpush.msra.mxu2 %v1222_v28  ;;  %v1551_v34 = vld.sshfl [vmem:[#allocation1 + $0x8] sm:$0xff pattern:$0x73625140]  ;;  %v1228_v60 = vld [vmem:[%s3356_s3 + $0x200] sm:$0xff]  ;;  %v1258_v13 = vld [vmem:[%s3356_s3 + $0x2f0] sm:$0xff] }
 0x269   :  { %1609 = vmatpush.msra.mxu1 %v1206_v53  ;;  %1649 = vmatpush.msra.mxu3 %v1238_v19  ;;  %v1552_v30 = vld.sshfl [vmem:[#allocation1 + $0x10] sm:$0xff pattern:$0x73625140]  ;;  %v1275_v7 = vld [vmem:[%s3356_s3 + $0x378] sm:$0xff]  ;;  %v1257_v2 = vld [vmem:[%s3356_s3 + $0x2e8] sm:$0xff] }
 0x26a   :  { %1590 = vmatpush.msra.mxu0 %v1189_v38  ;;  %1630 = vmatpush.msra.mxu2 %v1221_v52  ;;  %v1274_v10 = vld [vmem:[%s3356_s3 + $0x370] sm:$0xff]  ;;  %v1256_v57 = vld [vmem:[%s3356_s3 + $0x2e0] sm:$0xff]  ;;  %v1273_v29 = vld [vmem:[%s3356_s3 + $0x368] sm:$0xff] }
 0x26b   :  { %1610 = vmatpush.msra.mxu1 %v1205_v51  ;;  %1650 = vmatpush.msra.mxu3 %v1237_v59  ;;  %v1397_v9 = vld.sshfl [vmem:[#allocation1 + $0x20] sm:$0xff pattern:$0x73625140]  ;;  %v1398_v15 = vld.sshfl [vmem:[#allocation1 + $0x28] sm:$0xff pattern:$0x73625140] }
 0x26c   :  { %1591 = vmatpush.msra.mxu0 %v1188_v17  ;;  %1631 = vmatpush.msra.mxu2 %v1220_v42  ;;  %v1399_v55 = vld.sshfl [vmem:[#allocation1 + $0x30] sm:$0xff pattern:$0x73625140]  ;;  %v1255_v41 = vld [vmem:[%s3356_s3 + $0x2d8] sm:$0xff]  ;;  %v1272_v54 = vld [vmem:[%s3356_s3 + $0x360] sm:$0xff] }
 0x26d   :  { %1503 = vmatmul.f32.vlgmr.msrb.gmra.mxu0 %v1397_v9  ;;  %1523 = vmatmul.f32.vlgmr.msrb.gmra.mxu1 %v1398_v15  ;;  %1549 = vst [vmem:[#allocation1 + $0x20] ss:$4 sm:$0xff] %v1859_v1  ;;  %v1218_v1 = vld [vmem:[%s3356_s3 + $0x1b0] sm:$0xff]  ;;  %v1271_v56 = vld [vmem:[%s3356_s3 + $0x358] sm:$0xff]  ;;  %v1253_v43 = vld [vmem:[%s3356_s3 + $0x2c8] sm:$0xff] }
 0x26e   :  { %1543 = vmatmul.f32.vlgmr.msrb.gmra.mxu2 %v1399_v55  ;;  %1592 = vmatpush.msra.mxu0 %v1187_v8  ;;  %v1254_v3 = vld [vmem:[%s3356_s3 + $0x2d0] sm:$0xff]  ;;  %v1252_v28 = vld [vmem:[%s3356_s3 + $0x2c0] sm:$0xff]  ;;  %v1269_v53 = vld [vmem:[%s3356_s3 + $0x348] sm:$0xff] }
 0x26f   :  { %1611 = vmatpush.msra.mxu1 %v1204_v36  ;;  %1632 = vmatpush.msra.mxu2 %v1219_v48  ;;  %v1270_v44 = vld [vmem:[%s3356_s3 + $0x350] sm:$0xff]  ;;  %v1251_v19 = vld [vmem:[%s3356_s3 + $0x2b8] sm:$0xff]  ;;  %v1268_v38 = vld [vmem:[%s3356_s3 + $0x340] sm:$0xff] }
 0x270   :  { %1651 = vmatpush.msra.mxu3 %v1236_v12  ;;  %1593 = vmatpush.msra.mxu0 %v1186_v35  ;;  %v1250_v52 = vld [vmem:[%s3356_s3 + $0x2b0] sm:$0xff]  ;;  %v1267_v51 = vld [vmem:[%s3356_s3 + $0x338] sm:$0xff]  ;;  %v1249_v59 = vld [vmem:[%s3356_s3 + $0x2a8] sm:$0xff] }
 0x271   :  { %1580 = vmatmul.f32.vlgmr.msrb.gmra.mxu3 %v1550_v33  ;;  %1612 = vmatpush.msra.mxu1 %v1203_v50  ;;  %v1266_v17 = vld [vmem:[%s3356_s3 + $0x330] sm:$0xff]  ;;  %v1248_v42 = vld [vmem:[%s3356_s3 + $0x2a0] sm:$0xff]  ;;  %v1265_v8 = vld [vmem:[%s3356_s3 + $0x328] sm:$0xff] }
 0x272   :  { %1633 = vmatpush.msra.mxu2 %v1218_v1  ;;  %1652 = vmatpush.msra.mxu3 %v1235_v27  ;;  %v1247_v9 = vld [vmem:[%s3356_s3 + $0x298] sm:$0xff]  ;;  %v1264_v15 = vld [vmem:[%s3356_s3 + $0x320] sm:$0xff]  ;;  %v1246_v55 = vld [vmem:[%s3356_s3 + $0x290] sm:$0xff] }
 0x273   :  { %1594 = vmatpush.msra.mxu0 %v1185_v5  ;;  %1613 = vmatpush.msra.mxu1 %v1202_v63  ;;  %v1263_v36 = vld [vmem:[%s3356_s3 + $0x318] sm:$0xff]  ;;  %v1245_v48 = vld [vmem:[%s3356_s3 + $0x288] sm:$0xff]  ;;  %v1262_v12 = vld [vmem:[%s3356_s3 + $0x310] sm:$0xff] }
 0x274   :  { %1634 = vmatpush.msra.mxu2 %v1217_v16  ;;  %1653 = vmatpush.msra.mxu3 %v1234_v37  ;;  %v1554_v22 = vld.sshfl [vmem:[#allocation1 + $0x20] sm:$0xff pattern:$0x73625140]  ;;  %v1261_v33 = vld [vmem:[%s3356_s3 + $0x308] sm:$0xff] }
 0x275   :  { %1595 = vmatpush.msra.mxu0 %v1184_v39  ;;  %1614 = vmatpush.msra.mxu1 %v1201_v40  ;;  %v1244_v35 = vld [vmem:[%s3356_s3 + $0x280] sm:$0xff]  ;;  %v1555_v50 = vld.sshfl [vmem:[#allocation1 + $0x28] sm:$0xff pattern:$0x73625140] }
 0x276   :  { %1635 = vmatpush.msra.mxu2 %v1216_v31  ;;  %1654 = vmatpush.msra.mxu3 %v1233_v32  ;;  %v1260_v1 = vld [vmem:[%s3356_s3 + $0x300] sm:$0xff]  ;;  %v1556_v27 = vld.sshfl [vmem:[#allocation1 + $0x30] sm:$0xff pattern:$0x73625140] }
 0x277   :  { %1596 = vmatpush.msra.mxu0 %v1183_v46  ;;  %1615 = vmatpush.msra.mxu1 %v1200_v26 }
 0x278   :  { %1636 = vmatpush.msra.mxu2 %v1215_v11  ;;  %1655 = vmatpush.msra.mxu3 %v1232_v49 }
 0x279   :  { %1597 = vmatpush.msra.mxu0 %v1182_v62  ;;  %1616 = vmatpush.msra.mxu1 %v1199_v58 }
 0x27a   :  { %1637 = vmatpush.msra.mxu2 %v1214_v18  ;;  %1656 = vmatpush.msra.mxu3 %v1231_v14 }
 0x27b   :  { %1598 = vmatpush.msra.mxu0 %v1181_v24  ;;  %1617 = vmatpush.msra.mxu1 %v1198_v23 }
 0x27c   :  { %1638 = vmatpush.msra.mxu2 %v1213_v47  ;;  %1657 = vmatpush.msra.mxu3 %v1230_v20 }
 0x27d   :  { %1599 = vmatpush.msra.mxu0 %v1180_v6  ;;  %1618 = vmatpush.msra.mxu1 %v1197_v21 }
 0x27e   :  { %1639 = vmatpush.msra.mxu2 %v1212_v61  ;;  %1658 = vmatpush.msra.mxu3 %v1229_v0 }
 0x27f   :  { %1600 = vmatmul.f32.vlgmr.msra.gmra.mxu0 %v1551_v34  ;;  %1640 = vmatmul.f32.vlgmr.msra.gmra.mxu2 %v1553_v45  ;;  %v1758_v45 = vld [vmem:[%s3358_s5] ss:$0 sm:$0xff] }
 0x280   :  { %1664 = vmatpush.msrb.mxu0 %v1259_v25  ;;  %1619 = vmatpush.msra.mxu1 %v1196_v4 }
 0x281   :  { %1659 = vmatpush.msra.mxu3 %v1228_v60  ;;  %1620 = vmatmul.f32.vlgmr.msra.gmra.mxu1 %v1552_v30 }
 0x282   :  { %1660 = vmatmul.f32.vlgmr.msra.gmra.mxu3 %v1554_v22  ;;  %1665 = vmatpush.msrb.mxu0 %v1258_v13 }
 0x283   :  { %1684 = vmatpush.msrb.mxu1 %v1275_v7 }
 0x284   :  { %1666 = vmatpush.msrb.mxu0 %v1257_v2 }
 0x285   :  { %1685 = vmatpush.msrb.mxu1 %v1274_v10 }
 0x286   :  { %1667 = vmatpush.msrb.mxu0 %v1256_v57 }
 0x287   :  { %1686 = vmatpush.msrb.mxu1 %v1273_v29 }
 0x288   :  { %1668 = vmatpush.msrb.mxu0 %v1255_v41 }
 0x289   :  { %1687 = vmatpush.msrb.mxu1 %v1272_v54 }
 0x28a   :  { %1669 = vmatpush.msrb.mxu0 %v1254_v3 }
 0x28b   :  { %1688 = vmatpush.msrb.mxu1 %v1271_v56 }
 0x28c   :  { %1670 = vmatpush.msrb.mxu0 %v1253_v43 }
 0x28d   :  { %1689 = vmatpush.msrb.mxu1 %v1270_v44 }
 0x28e   :  { %1671 = vmatpush.msrb.mxu0 %v1252_v28 }
 0x28f   :  { %1690 = vmatpush.msrb.mxu1 %v1269_v53 }
 0x290   :  { %1672 = vmatpush.msrb.mxu0 %v1251_v19 }
 0x291   :  { %1691 = vmatpush.msrb.mxu1 %v1268_v38 }
 0x292   :  { %1673 = vmatpush.msrb.mxu0 %v1250_v52 }
 0x293   :  { %1692 = vmatpush.msrb.mxu1 %v1267_v51 }
 0x294   :  { %1674 = vmatpush.msrb.mxu0 %v1249_v59 }
 0x295   :  { %1693 = vmatpush.msrb.mxu1 %v1266_v17 }
 0x296   :  { %1675 = vmatpush.msrb.mxu0 %v1248_v42 }
 0x297   :  { %1694 = vmatpush.msrb.mxu1 %v1265_v8 }
 0x298   :  { %1676 = vmatpush.msrb.mxu0 %v1247_v9 }
 0x299   :  { %1695 = vmatpush.msrb.mxu1 %v1264_v15 }
 0x29a   :  { %1677 = vmatpush.msrb.mxu0 %v1246_v55 }
 0x29b   :  { %1696 = vmatpush.msrb.mxu1 %v1263_v36 }
 0x29c   :  { %1678 = vmatpush.msrb.mxu0 %v1245_v48 }
 0x29d   :  { %1697 = vmatpush.msrb.mxu1 %v1262_v12 }
 0x29e   :  { %1679 = vmatpush.msrb.mxu0 %v1244_v35 }
 0x29f   :  { %1698 = vmatpush.msrb.mxu1 %v1261_v33  ;;  %1680 = vmatmul.f32.vlgmr.msrb.gmra.mxu0 %v1555_v50 }
 0x2a1   :  { %1699 = vmatpush.msrb.mxu1 %v1260_v1 }
 0x2a2   :  { %1700 = vmatmul.f32.vlgmr.msrb.gmra.mxu1 %v1556_v27 }
 0x2d9   :  { %v1424_v5 = vpop.f32.mrf.mxu0  ;;  %v1444_v63 = vpop.f32.mrf.mxu1 }
 0x2da   :  { %v1445_v37 = vadd.f32 %v1444_v63, %v1424_v5 }
 0x2e0   :  { %v1464_v16 = vpop.f32.mrf.mxu2  ;;  %v1484_v40 = vpop.f32.mrf.mxu3 }
 0x2e1   :  { %v1465_v39 = vadd.f32 %v1464_v16, %v1445_v37 }
 0x2e3   :  { %v1485_v32 = vadd.f32 %v1484_v40, %v1465_v39 }
 0x2ea   :  { %v1504_v31 = vpop.f32.mrf.mxu0  ;;  %v1524_v26 = vpop.f32.mrf.mxu1 }
 0x2eb   :  { %v1505_v46 = vadd.f32 %v1504_v31, %v1485_v32 }
 0x2ed   :  { %v1525_v49 = vadd.f32 %v1524_v26, %v1505_v46 }
 0x2f1   :  { %v1544_v11 = vpop.f32.mrf.mxu2 }
 0x2f2   :  { %v1545_v62 = vadd.f32 %v1544_v11, %v1525_v49 }
 0x2f4   :  { %v1581_v58 = vpop.f32.mrf.mxu3 }
 0x2f5   :  { %v1582_v14 = vadd.f32 %v1581_v58, %v1545_v62 }
 0x2fc   :  { %v1601_v18 = vpop.f32.mrf.mxu0 }
 0x2fd   :  { %v1602_v24 = vadd.f32 %v1601_v18, %v1582_v14 }
 0x2fe   :  { %v1621_v23 = vpop.f32.mrf.mxu1 }
 0x2ff   :  { %v1622_v20 = vadd.f32 %v1621_v23, %v1602_v24 }
 0x302   :  { %v1641_v47 = vpop.f32.mrf.mxu2 }
 0x303   :  { %v1642_v6 = vadd.f32 %v1641_v47, %v1622_v20 }
 0x305   :  { %v1661_v21 = vpop.f32.mrf.mxu3 }
 0x306   :  { %v1662_v61 = vadd.f32 %v1661_v21, %v1642_v6 }
 0x31c   :  { %v1681_v0 = vpop.f32.mrf.mxu0 }
 0x31d   :  { %v1682_v34 = vadd.f32 %v1681_v0, %v1662_v61 }
 0x31f   :  { %v1701_v25 = vpop.f32.mrf.mxu1 }
 0x320   :  { %v1702_v4 = vadd.f32 %v1701_v25, %v1682_v34 }
 0x322   :  { %v1708_v60 = vadd.f32 %v1758_v45, %v1702_v4 }
 0x324   :  { %1710 = vst.msk [vmem:[#allocation5] sm:$0x3] %vm1709_vm11, %v1708_v60 }
 0x325   :  { %1721 = dma.vmem_to_hbm [thread:$0]  %s1717_s26, 32, %s1719_s27, [#allocation3]  }
 0x326   :  { %1801 = dma.done.wait [#allocation3], 32  }
 0x327   :  { %1802 = vsyncadd [#allocation3], 4294967264 }
 0x328   :  { %1726 = vsyncpa [#allocation3], 1 }
 0x329   :  { %1727 = vsyncpa [#allocation4], 1 }

</bundles_post_ra>
